<compile_context>
chip_gen: v7x
topology: tpu7x:2x2x1
jax: 0.10.0
libtpu: 0.0.40
codegen_flags: <defaults>
</compile_context>

<pallas_src>
import math
from functools import partial

import numpy as np
import jax
import jax.numpy as jnp
from jax import lax
from jax.experimental import pallas as pl
from jax.experimental.pallas import tpu as pltpu

EMB_DIM = 32                       # emb_dim (kept == vocab_size[2]; reference
                                   # only shape-checks when voc[2] == emb_dim)
VOCAB_SIZE = (40, 40, 32)          # (diag, proc, med)
NUM_HEADS = 2


# ============================================================================
# Single fused kernel: encoder + graph memory + decoder
# ============================================================================

def _fused_kernel(T, E, G, V, num_heads, has_history,
                  x_ref, wih_ref, bih_ref, whh_ref, bhh_ref, qw_ref, qb_ref,
                  ehr_ref, mask_ref, g1w_ref, g1b_ref, g2w_ref, g2b_ref,
                  gatw_ref, asrc_ref, adst_ref, gatb_ref,
                  hv_ref, wqkv_ref, bqkv_ref, wo_ref, bo_ref,
                  w1_ref, b1_ref, w2_ref, b2_ref, inter_ref,
                  out_ref, h_scratch):
    f32 = jnp.float32

    def softmax_rows(s):
        s = s - jnp.max(s, axis=-1, keepdims=True)
        p = jnp.exp(s)
        return p * pl.reciprocal(jnp.sum(p, axis=-1, keepdims=True), approx=True)

    def dot_bt(a, b):   # a @ b.T without materialising a transpose
        return lax.dot_general(a, b, (((1,), (1,)), ((), ())),
                               preferred_element_type=f32)

    # -------- Phase 1: fused dual-GRU encoder + query projection ------------
    # Input projection hoisted off the recurrence critical path.
    xp_all = jnp.dot(x_ref[...], wih_ref[...],
                     preferred_element_type=f32) + bih_ref[...]       # (T, 3G)
    bhh = bhh_ref[...]
    h = jnp.zeros((1, G), f32)                  # [h1 | h2]
    for t in range(T):                          # T static -> fully unrolled
        # per-use read of the big recurrent weight (short live range, no spill)
        hp = jnp.dot(h, whh_ref[...], preferred_element_type=f32) + bhh
        xp = xp_all[t:t + 1, :]
        # gate layout [r1|r2 | z1|z2 | n1|n2] -> 128-lane aligned slices
        r = jax.nn.sigmoid(xp[:, 0 * G:1 * G] + hp[:, 0 * G:1 * G])
        z = jax.nn.sigmoid(xp[:, 1 * G:2 * G] + hp[:, 1 * G:2 * G])
        n = jnp.tanh(xp[:, 2 * G:3 * G] + r * hp[:, 2 * G:3 * G])
        h = (1.0 - z) * n + z * h
        h_scratch[t:t + 1, :] = h
    # queries = ReLU([o1|o2]) @ q_w + q_b as ONE (T,G)x(G,E) matmul
    queries = jnp.dot(jnp.maximum(h_scratch[0:T, :], 0.0), qw_ref[...],
                      preferred_element_type=f32) + qb_ref[...]       # (T, E)

    # -------- Phase 2: graph memory bank (row-norm + 2xGCN + GAT + combine) --
    ii = lax.broadcasted_iota(jnp.int32, (V, V), 0)
    jj = lax.broadcasted_iota(jnp.int32, (V, V), 1)
    eye = (ii == jj).astype(f32)

    adj = ehr_ref[...] + eye
    # row sums are >= 1 because of the +I above, so the reciprocal is safe
    rowsum = jnp.sum(adj, axis=1, keepdims=True)
    adj_n = adj * pl.reciprocal(rowsum, approx=True)

    # GCN layer 1 (input is identity -> eye @ W == W, matmul elided)
    h1 = jnp.maximum(jnp.dot(adj_n, g1w_ref[...], preferred_element_type=f32)
                     + g1b_ref[...], 0.0)
    gcn_emb = jnp.dot(adj_n,
                      jnp.dot(h1, g2w_ref[...], preferred_element_type=f32),
                      preferred_element_type=f32) + g2b_ref[...]

    # dense 2-head GAT over the DDI graph (input identity -> h_all == gat_w)
    h_all = gatw_ref[...]                       # (V, heads*E)
    fout = h_all.shape[1] // num_heads
    mask = mask_ref[...]
    acc = jnp.zeros((V, fout), f32)
    for hd in range(num_heads):                 # static python loop (2 heads)
        hh = h_all[:, hd * fout:(hd + 1) * fout]
        a_d = dot_bt(hh, adst_ref[hd:hd + 1, :])            # (V, 1) dst scores
        a_s = dot_bt(asrc_ref[hd:hd + 1, :], hh)            # (1, V) src scores
        e = a_d + a_s                           # e[i, j] = dst_i + src_j
        e = jnp.where(e > 0, e, 0.2 * e)        # LeakyReLU(0.2)
        e = jnp.where(mask > 0, e, -1e30)
        attn = softmax_rows(e)
        acc = acc + jnp.dot(attn, hh, preferred_element_type=f32)
    gat_emb = acc * (1.0 / num_heads) + gatb_ref[...]

    # drug_memory = gcn - inter * gat   (inter scalar read from SMEM)
    mem = gcn_emb - gat_emb * inter_ref[0]                              # (V, E)

    # -------- Phase 3: decoder (memory reads + cross-attn + output MLP) -----
    query = queries[T - 1:T, :]                 # (1, E)

    # fact1: read from the global graph memory bank
    fact1 = jnp.dot(softmax_rows(dot_bt(query, mem)), mem,
                    preferred_element_type=f32)                         # (1, E)

    # fact2: read from the dynamic (history) memory bank
    if has_history:
        hk = queries[0:T - 1, :]                # (T-1, E)
        vw = softmax_rows(dot_bt(query, hk))                            # (1,T-1)
        wv = jnp.dot(vw, hv_ref[...], preferred_element_type=f32)       # (1, V)
        fact2 = jnp.dot(wv, mem, preferred_element_type=f32)
    else:
        fact2 = fact1

    # cross attention over rows [query, fact1, fact2] (stack without concat)
    rid = lax.broadcasted_iota(jnp.int32, (3, E), 0)
    x = (jnp.where(rid == 0, query, 0.0)
         + jnp.where(rid == 1, fact1, 0.0)
         + jnp.where(rid == 2, fact2, 0.0))     # (3, E)

    qkv = jnp.dot(x, wqkv_ref[...], preferred_element_type=f32) + bqkv_ref[...]
    qm = qkv[:, 0 * E:1 * E]
    km = qkv[:, 1 * E:2 * E]
    vm = qkv[:, 2 * E:3 * E]
    hd_dim = E // num_heads
    scale = 1.0 / math.sqrt(hd_dim)
    wo = wo_ref[...]
    mha = bo_ref[...]                           # (1, E) broadcasts to (3, E)
    for h_i in range(num_heads):                # static python loop (2 heads)
        sl = slice(h_i * hd_dim, (h_i + 1) * hd_dim)
        attn = softmax_rows(dot_bt(qm[:, sl] * scale, km[:, sl]))       # (3, 3)
        oh = jnp.dot(attn, vm[:, sl], preferred_element_type=f32)       # (3,hd)
        mha = mha + jnp.dot(oh, wo[sl, :], preferred_element_type=f32)
    cmean = jnp.mean(mha, axis=0, keepdims=True)                        # (1, E)

    # output MLP: Linear2(ReLU(Linear1(ReLU(cat)))); Linear1 on the (1,4E)
    # concat realised as a sum of per-chunk matmuls (no lane concat).
    w1 = w1_ref[...]
    hmid = (jnp.dot(jnp.maximum(query, 0.0), w1[0 * E:1 * E, :], preferred_element_type=f32)
            + jnp.dot(jnp.maximum(fact1, 0.0), w1[1 * E:2 * E, :], preferred_element_type=f32)
            + jnp.dot(jnp.maximum(fact2, 0.0), w1[2 * E:3 * E, :], preferred_element_type=f32)
            + jnp.dot(jnp.maximum(cmean, 0.0), w1[3 * E:4 * E, :], preferred_element_type=f32)
            + b1_ref[...])
    out_ref[...] = jnp.dot(jnp.maximum(hmid, 0.0), w2_ref[...],
                           preferred_element_type=f32) + b2_ref[...]


# ============================================================================
# One-time host-side weight packing (hoisted off the per-call path)
# ============================================================================

def _pack_gru_weight(w1, w2, hidden):
    """w1, w2: (in_dim, 3*hidden), torch gate order (r,z,n) on the out axis.
    Returns block-diag weight with gate layout [r1|r2 | z1|z2 | n1|n2]."""
    w1 = np.asarray(w1)
    w2 = np.asarray(w2)
    in1, in2 = w1.shape[0], w2.shape[0]
    G = 2 * hidden
    out = np.zeros((in1 + in2, 3 * G), np.float32)
    for g in range(3):
        out[:in1, g * G:g * G + hidden] = w1[:, g * hidden:(g + 1) * hidden]
        out[in1:, g * G + hidden:(g + 1) * G] = w2[:, g * hidden:(g + 1) * hidden]
    return jnp.asarray(out)


def _pack_gru_bias(b1, b2, hidden):
    b1 = np.asarray(b1)
    b2 = np.asarray(b2)
    parts = []
    for g in range(3):
        parts.append(b1[g * hidden:(g + 1) * hidden])
        parts.append(b2[g * hidden:(g + 1) * hidden])
    return jnp.asarray(np.concatenate(parts)[None, :])


def pack_params(params, ddi_adj):
    """Pack / concatenate all weights once; also precompute the static GAT mask."""
    E = EMB_DIM
    H = 2 * E
    voc_m = VOCAB_SIZE[2]
    gat_mask = ((np.asarray(ddi_adj).T != 0)
                | np.eye(voc_m, dtype=bool)).astype(np.float32)
    return {
        "emb0": params["emb0"], "emb1": params["emb1"],
        "wih_bd": _pack_gru_weight(params["gru0_wih"], params["gru1_wih"], H),
        "whh_bd": _pack_gru_weight(params["gru0_whh"], params["gru1_whh"], H),
        "bih_bd": _pack_gru_bias(params["gru0_bih"], params["gru1_bih"], H),
        "bhh_bd": _pack_gru_bias(params["gru0_bhh"], params["gru1_bhh"], H),
        "q_w": params["q_w"], "q_b": params["q_b"].reshape(1, E),
        "gcn1_w": params["gcn1_w"], "gcn1_b": params["gcn1_b"].reshape(1, E),
        "gcn2_w": params["gcn2_w"], "gcn2_b": params["gcn2_b"].reshape(1, E),
        "gat_w": params["gat_w"], "gat_asrc": params["gat_asrc"],
        "gat_adst": params["gat_adst"], "gat_b": params["gat_b"].reshape(1, E),
        "gat_mask": jnp.asarray(gat_mask),
        "inter": params["inter"],
        "wqkv": jnp.concatenate(
            [params["mha_wq"], params["mha_wk"], params["mha_wv"]], axis=1),
        "bqkv": jnp.concatenate(
            [params["mha_bq"], params["mha_bk"], params["mha_bv"]]).reshape(1, -1),
        "mha_wo": params["mha_wo"], "mha_bo": params["mha_bo"].reshape(1, E),
        "out1_w": params["out1_w"], "out1_b": params["out1_b"].reshape(1, -1),
        "out2_w": params["out2_w"], "out2_b": params["out2_b"].reshape(1, -1),
    }


# ============================================================================
# Parameter init (deterministic, synthetic) and forward wrapper
# ============================================================================

def _u(key, shape, scale=0.1):
    return jax.random.uniform(key, shape, jnp.float32, -scale, scale)


def init_params(key):
    E = EMB_DIM
    H = 2 * E
    voc_d, voc_p, voc_m = VOCAB_SIZE
    ks = iter(jax.random.split(key, 40))
    p = {}
    p["emb0"] = _u(next(ks), (voc_d, E))
    p["emb1"] = _u(next(ks), (voc_p, E))
    for i in range(2):                           # GRU weights stored as (in, out)
        p[f"gru{i}_wih"] = _u(next(ks), (E, 3 * H))
        p[f"gru{i}_whh"] = _u(next(ks), (H, 3 * H))
        p[f"gru{i}_bih"] = _u(next(ks), (3 * H,))
        p[f"gru{i}_bhh"] = _u(next(ks), (3 * H,))
    p["q_w"] = _u(next(ks), (4 * E, E))
    p["q_b"] = _u(next(ks), (E,))
    p["gcn1_w"] = _u(next(ks), (voc_m, E))
    p["gcn1_b"] = _u(next(ks), (E,))
    p["gcn2_w"] = _u(next(ks), (E, E))
    p["gcn2_b"] = _u(next(ks), (E,))
    p["gat_w"] = _u(next(ks), (E, 2 * E))        # 2 heads
    p["gat_asrc"] = _u(next(ks), (2, E))
    p["gat_adst"] = _u(next(ks), (2, E))
    p["gat_b"] = _u(next(ks), (E,))
    p["inter"] = _u(next(ks), (1,))
    p["mha_wq"] = _u(next(ks), (E, E))
    p["mha_wk"] = _u(next(ks), (E, E))
    p["mha_wv"] = _u(next(ks), (E, E))
    p["mha_bq"] = _u(next(ks), (E,))
    p["mha_bk"] = _u(next(ks), (E,))
    p["mha_bv"] = _u(next(ks), (E,))
    p["mha_wo"] = _u(next(ks), (E, E))
    p["mha_bo"] = _u(next(ks), (E,))
    p["out1_w"] = _u(next(ks), (4 * E, 2 * E))
    p["out1_b"] = _u(next(ks), (2 * E,))
    p["out2_w"] = _u(next(ks), (2 * E, voc_m))
    p["out2_b"] = _u(next(ks), (voc_m,))
    return p


def prepare_inputs(input_adms):
    """Host-side, one-time: padded code index/mask arrays + history one-hots."""
    T = len(input_adms)
    voc_m = VOCAB_SIZE[2]
    L1 = max(len(a[0]) for a in input_adms)
    L2 = max(len(a[1]) for a in input_adms)
    idx1 = np.zeros((T, L1), np.int32)
    msk1 = np.zeros((T, L1), np.float32)
    idx2 = np.zeros((T, L2), np.int32)
    msk2 = np.zeros((T, L2), np.float32)
    for t, adm in enumerate(input_adms):
        idx1[t, :len(adm[0])] = np.asarray(adm[0], np.int32)
        msk1[t, :len(adm[0])] = 1.0
        idx2[t, :len(adm[1])] = np.asarray(adm[1], np.int32)
        msk2[t, :len(adm[1])] = 1.0
    if T > 1:
        hv = np.zeros((T - 1, voc_m), np.float32)
        for i, adm in enumerate(input_adms[:-1]):
            hv[i, np.asarray(adm[2], np.int64)] = 1.0
    else:
        hv = np.zeros((1, voc_m), np.float32)    # unused dummy
    return (jnp.asarray(idx1), jnp.asarray(msk1),
            jnp.asarray(idx2), jnp.asarray(msk2), jnp.asarray(hv))


@jax.jit
def hermes_kiosk_forward(packed, ehr_adj, idx1, msk1, idx2, msk2, hv):
    E = EMB_DIM
    H = 2 * E                                    # GRU hidden size
    G = 2 * H                                    # packed gate width (both GRUs)
    voc_m = VOCAB_SIZE[2]
    T = idx1.shape[0]                            # static under jit
    has_history = T > 1

    # I: visit-level mean embeddings (batched gather, dropout = eval identity)
    def masked_mean(table, idx, msk):
        emb = table[idx]                         # (T, L, E)
        m = msk[..., None]
        return jnp.sum(emb * m, axis=1) / jnp.sum(m, axis=1)

    i1_seq = masked_mean(packed["emb0"], idx1, msk1)
    i2_seq = masked_mean(packed["emb1"], idx2, msk2)
    x_cat = jnp.concatenate([i1_seq, i2_seq], axis=-1)              # (T, 2E)

    vmem = pl.BlockSpec(memory_space=pltpu.MemorySpace.VMEM)
    smem = pl.BlockSpec(memory_space=pltpu.MemorySpace.SMEM)
    t_pad = max(8, ((T + 7) // 8) * 8)

    out = pl.pallas_call(
        partial(_fused_kernel, T, E, G, voc_m, NUM_HEADS, has_history),
        out_shape=jax.ShapeDtypeStruct((1, voc_m), jnp.float32),
        in_specs=[vmem] * 26 + [smem],
        out_specs=vmem,
        scratch_shapes=[pltpu.VMEM((t_pad, G), jnp.float32)],
    )(x_cat,
      packed["wih_bd"], packed["bih_bd"], packed["whh_bd"], packed["bhh_bd"],
      packed["q_w"], packed["q_b"],
      ehr_adj, packed["gat_mask"],
      packed["gcn1_w"], packed["gcn1_b"], packed["gcn2_w"], packed["gcn2_b"],
      packed["gat_w"], packed["gat_asrc"], packed["gat_adst"], packed["gat_b"],
      hv,
      packed["wqkv"], packed["bqkv"], packed["mha_wo"], packed["mha_bo"],
      packed["out1_w"], packed["out1_b"], packed["out2_w"], packed["out2_b"],
      packed["inter"])
    return out                                                       # (1, voc_m)


# ============================================================================

if __name__ == "__main__":
    key = jax.random.PRNGKey(0)
    kp, ka, kd = jax.random.split(key, 3)
    params = init_params(kp)

    voc_m = VOCAB_SIZE[2]
    # symmetric 0/1 adjacency matrices (deterministic)
    ehr = jax.random.bernoulli(ka, 0.15, (voc_m, voc_m)).astype(jnp.float32)
    ehr_adj = jnp.maximum(ehr, ehr.T) * (1.0 - jnp.eye(voc_m))
    ddi = jax.random.bernoulli(kd, 0.10, (voc_m, voc_m)).astype(jnp.float32)
    ddi_adj = jnp.maximum(ddi, ddi.T) * (1.0 - jnp.eye(voc_m))

    packed = pack_params(params, ddi_adj)        # one-time weight packing

    # three admissions: [diag codes, proc codes, med codes]
    input_adms = [
        [[0, 5, 7], [1, 3], [2, 9, 11]],
        [[2, 8], [4, 6, 10], [1, 7]],
        [[3, 12, 15, 20], [5, 9], [0, 4, 13, 30]],
    ]
    idx1, msk1, idx2, msk2, hv = prepare_inputs(input_adms)

    out = hermes_kiosk_forward(packed, ehr_adj, idx1, msk1, idx2, msk2, hv)
    out = jax.block_until_ready(out)
    assert out.shape == (1, voc_m), out.shape
    assert bool(jnp.all(jnp.isfinite(out)))
    print("KERNEL_OK")
</pallas_src>

<mosaic_0001>
module attributes {stable_mosaic.version = 11 : i64} {
  func.func @_fused_kernel(%arg0: memref<3x64xf32, #tpu.memory_space<vmem>>, %arg1: memref<64x384xf32, #tpu.memory_space<vmem>>, %arg2: memref<1x384xf32, #tpu.memory_space<vmem>>, %arg3: memref<128x384xf32, #tpu.memory_space<vmem>>, %arg4: memref<1x384xf32, #tpu.memory_space<vmem>>, %arg5: memref<128x32xf32, #tpu.memory_space<vmem>>, %arg6: memref<1x32xf32, #tpu.memory_space<vmem>>, %arg7: memref<32x32xf32, #tpu.memory_space<vmem>>, %arg8: memref<32x32xf32, #tpu.memory_space<vmem>>, %arg9: memref<32x32xf32, #tpu.memory_space<vmem>>, %arg10: memref<1x32xf32, #tpu.memory_space<vmem>>, %arg11: memref<32x32xf32, #tpu.memory_space<vmem>>, %arg12: memref<1x32xf32, #tpu.memory_space<vmem>>, %arg13: memref<32x64xf32, #tpu.memory_space<vmem>>, %arg14: memref<2x32xf32, #tpu.memory_space<vmem>>, %arg15: memref<2x32xf32, #tpu.memory_space<vmem>>, %arg16: memref<1x32xf32, #tpu.memory_space<vmem>>, %arg17: memref<2x32xf32, #tpu.memory_space<vmem>>, %arg18: memref<32x96xf32, #tpu.memory_space<vmem>>, %arg19: memref<1x96xf32, #tpu.memory_space<vmem>>, %arg20: memref<32x32xf32, #tpu.memory_space<vmem>>, %arg21: memref<1x32xf32, #tpu.memory_space<vmem>>, %arg22: memref<128x64xf32, #tpu.memory_space<vmem>>, %arg23: memref<1x64xf32, #tpu.memory_space<vmem>>, %arg24: memref<64x32xf32, #tpu.memory_space<vmem>>, %arg25: memref<1x32xf32, #tpu.memory_space<vmem>>, %arg26: memref<1xf32, #tpu.memory_space<smem>>, %arg27: memref<1x32xf32, #tpu.memory_space<vmem>>, %arg28: memref<8x128xf32, #tpu.memory_space<vmem>>) attributes {dimension_semantics = [], scalar_prefetch = 0 : i64, scratch_operands = 1 : i64, tpu.core_type = #tpu.core_type<tc>} {
    %c0 = arith.constant 0 : index
    %c0_0 = arith.constant 0 : index
    %0 = vector.load %arg0[%c0, %c0_0] : memref<3x64xf32, #tpu.memory_space<vmem>>, vector<3x64xf32>
    %c0_1 = arith.constant 0 : index
    %c0_2 = arith.constant 0 : index
    %1 = vector.load %arg1[%c0_1, %c0_2] : memref<64x384xf32, #tpu.memory_space<vmem>>, vector<64x384xf32>
    %cst = arith.constant dense<0.000000e+00> : vector<3x384xf32>
    %2 = tpu.matmul %0, %1, %cst {dimension_numbers = #tpu.dot_dimension_numbers<[1], [0], [0], [1], [0, 0, 1, 1], [], []>} : vector<3x64xf32>, vector<64x384xf32>, vector<3x384xf32> -> vector<3x384xf32>
    %c0_3 = arith.constant 0 : index
    %c0_4 = arith.constant 0 : index
    %3 = vector.load %arg2[%c0_3, %c0_4] : memref<1x384xf32, #tpu.memory_space<vmem>>, vector<1x384xf32>
    %4 = vector.broadcast %3 : vector<1x384xf32> to vector<3x384xf32>
    %5 = arith.addf %2, %4 : vector<3x384xf32>
    %c0_5 = arith.constant 0 : index
    %c0_6 = arith.constant 0 : index
    %6 = vector.load %arg4[%c0_5, %c0_6] : memref<1x384xf32, #tpu.memory_space<vmem>>, vector<1x384xf32>
    %cst_7 = arith.constant 0.000000e+00 : f32
    %7 = vector.broadcast %cst_7 : f32 to vector<1x128xf32>
    %c0_8 = arith.constant 0 : index
    %c0_9 = arith.constant 0 : index
    %8 = vector.load %arg3[%c0_8, %c0_9] : memref<128x384xf32, #tpu.memory_space<vmem>>, vector<128x384xf32>
    %cst_10 = arith.constant dense<0.000000e+00> : vector<1x384xf32>
    %9 = tpu.matmul %7, %8, %cst_10 {dimension_numbers = #tpu.dot_dimension_numbers<[1], [0], [0], [1], [0, 0, 1, 1], [], []>} : vector<1x128xf32>, vector<128x384xf32>, vector<1x384xf32> -> vector<1x384xf32>
    %10 = arith.addf %9, %6 : vector<1x384xf32>
    %11 = vector.extract_strided_slice %5 {offsets = [0, 0], sizes = [1, 384], strides = [1, 1]} : vector<3x384xf32> to vector<1x384xf32>
    %12 = vector.extract_strided_slice %11 {offsets = [0, 0], sizes = [1, 128], strides = [1, 1]} : vector<1x384xf32> to vector<1x128xf32>
    %13 = vector.extract_strided_slice %10 {offsets = [0, 0], sizes = [1, 128], strides = [1, 1]} : vector<1x384xf32> to vector<1x128xf32>
    %14 = arith.addf %12, %13 : vector<1x128xf32>
    %15 = arith.negf %14 : vector<1x128xf32>
    %16 = math.exp %15 : vector<1x128xf32>
    %cst_11 = arith.constant 1.000000e+00 : f32
    %17 = vector.broadcast %cst_11 : f32 to vector<1x128xf32>
    %18 = arith.addf %17, %16 : vector<1x128xf32>
    %19 = arith.divf %17, %18 : vector<1x128xf32>
    %20 = vector.extract_strided_slice %11 {offsets = [0, 128], sizes = [1, 128], strides = [1, 1]} : vector<1x384xf32> to vector<1x128xf32>
    %21 = vector.extract_strided_slice %10 {offsets = [0, 128], sizes = [1, 128], strides = [1, 1]} : vector<1x384xf32> to vector<1x128xf32>
    %22 = arith.addf %20, %21 : vector<1x128xf32>
    %23 = arith.negf %22 : vector<1x128xf32>
    %24 = math.exp %23 : vector<1x128xf32>
    %cst_12 = arith.constant 1.000000e+00 : f32
    %25 = vector.broadcast %cst_12 : f32 to vector<1x128xf32>
    %26 = arith.addf %25, %24 : vector<1x128xf32>
    %27 = arith.divf %25, %26 : vector<1x128xf32>
    %28 = vector.extract_strided_slice %11 {offsets = [0, 256], sizes = [1, 128], strides = [1, 1]} : vector<1x384xf32> to vector<1x128xf32>
    %29 = vector.extract_strided_slice %10 {offsets = [0, 256], sizes = [1, 128], strides = [1, 1]} : vector<1x384xf32> to vector<1x128xf32>
    %30 = arith.mulf %19, %29 : vector<1x128xf32>
    %31 = arith.addf %28, %30 : vector<1x128xf32>
    %32 = math.tanh %31 : vector<1x128xf32>
    %cst_13 = arith.constant 1.000000e+00 : f32
    %33 = vector.broadcast %cst_13 : f32 to vector<1x128xf32>
    %34 = arith.subf %33, %27 : vector<1x128xf32>
    %35 = arith.mulf %34, %32 : vector<1x128xf32>
    %36 = arith.mulf %27, %7 : vector<1x128xf32>
    %37 = arith.addf %35, %36 : vector<1x128xf32>
    %c0_14 = arith.constant 0 : index
    %c0_15 = arith.constant 0 : index
    %38 = vector.load %arg28[%c0_14, %c0_15] : memref<8x128xf32, #tpu.memory_space<vmem>>, vector<1x128xf32>
    tpu.vector_store %arg28[%c0_14, %c0_15], %37 {strides = array<i32>} : memref<8x128xf32, #tpu.memory_space<vmem>>, vector<1x128xf32>,
    %c0_16 = arith.constant 0 : index
    %c0_17 = arith.constant 0 : index
    %39 = vector.load %arg3[%c0_16, %c0_17] : memref<128x384xf32, #tpu.memory_space<vmem>>, vector<128x384xf32>
    %cst_18 = arith.constant dense<0.000000e+00> : vector<1x384xf32>
    %40 = tpu.matmul %37, %39, %cst_18 {dimension_numbers = #tpu.dot_dimension_numbers<[1], [0], [0], [1], [0, 0, 1, 1], [], []>} : vector<1x128xf32>, vector<128x384xf32>, vector<1x384xf32> -> vector<1x384xf32>
    %41 = arith.addf %40, %6 : vector<1x384xf32>
    %42 = vector.extract_strided_slice %5 {offsets = [1, 0], sizes = [1, 384], strides = [1, 1]} : vector<3x384xf32> to vector<1x384xf32>
    %43 = vector.extract_strided_slice %42 {offsets = [0, 0], sizes = [1, 128], strides = [1, 1]} : vector<1x384xf32> to vector<1x128xf32>
    %44 = vector.extract_strided_slice %41 {offsets = [0, 0], sizes = [1, 128], strides = [1, 1]} : vector<1x384xf32> to vector<1x128xf32>
    %45 = arith.addf %43, %44 : vector<1x128xf32>
    %46 = arith.negf %45 : vector<1x128xf32>
    %47 = math.exp %46 : vector<1x128xf32>
    %cst_19 = arith.constant 1.000000e+00 : f32
    %48 = vector.broadcast %cst_19 : f32 to vector<1x128xf32>
    %49 = arith.addf %48, %47 : vector<1x128xf32>
    %50 = arith.divf %48, %49 : vector<1x128xf32>
    %51 = vector.extract_strided_slice %42 {offsets = [0, 128], sizes = [1, 128], strides = [1, 1]} : vector<1x384xf32> to vector<1x128xf32>
    %52 = vector.extract_strided_slice %41 {offsets = [0, 128], sizes = [1, 128], strides = [1, 1]} : vector<1x384xf32> to vector<1x128xf32>
    %53 = arith.addf %51, %52 : vector<1x128xf32>
    %54 = arith.negf %53 : vector<1x128xf32>
    %55 = math.exp %54 : vector<1x128xf32>
    %cst_20 = arith.constant 1.000000e+00 : f32
    %56 = vector.broadcast %cst_20 : f32 to vector<1x128xf32>
    %57 = arith.addf %56, %55 : vector<1x128xf32>
    %58 = arith.divf %56, %57 : vector<1x128xf32>
    %59 = vector.extract_strided_slice %42 {offsets = [0, 256], sizes = [1, 128], strides = [1, 1]} : vector<1x384xf32> to vector<1x128xf32>
    %60 = vector.extract_strided_slice %41 {offsets = [0, 256], sizes = [1, 128], strides = [1, 1]} : vector<1x384xf32> to vector<1x128xf32>
    %61 = arith.mulf %50, %60 : vector<1x128xf32>
    %62 = arith.addf %59, %61 : vector<1x128xf32>
    %63 = math.tanh %62 : vector<1x128xf32>
    %cst_21 = arith.constant 1.000000e+00 : f32
    %64 = vector.broadcast %cst_21 : f32 to vector<1x128xf32>
    %65 = arith.subf %64, %58 : vector<1x128xf32>
    %66 = arith.mulf %65, %63 : vector<1x128xf32>
    %67 = arith.mulf %58, %37 : vector<1x128xf32>
    %68 = arith.addf %66, %67 : vector<1x128xf32>
    %c1 = arith.constant 1 : index
    %c0_22 = arith.constant 0 : index
    %69 = vector.load %arg28[%c1, %c0_22] : memref<8x128xf32, #tpu.memory_space<vmem>>, vector<1x128xf32>
    tpu.vector_store %arg28[%c1, %c0_22], %68 {strides = array<i32>} : memref<8x128xf32, #tpu.memory_space<vmem>>, vector<1x128xf32>,
    %c0_23 = arith.constant 0 : index
    %c0_24 = arith.constant 0 : index
    %70 = vector.load %arg3[%c0_23, %c0_24] : memref<128x384xf32, #tpu.memory_space<vmem>>, vector<128x384xf32>
    %cst_25 = arith.constant dense<0.000000e+00> : vector<1x384xf32>
    %71 = tpu.matmul %68, %70, %cst_25 {dimension_numbers = #tpu.dot_dimension_numbers<[1], [0], [0], [1], [0, 0, 1, 1], [], []>} : vector<1x128xf32>, vector<128x384xf32>, vector<1x384xf32> -> vector<1x384xf32>
    %72 = arith.addf %71, %6 : vector<1x384xf32>
    %73 = vector.extract_strided_slice %5 {offsets = [2, 0], sizes = [1, 384], strides = [1, 1]} : vector<3x384xf32> to vector<1x384xf32>
    %74 = vector.extract_strided_slice %73 {offsets = [0, 0], sizes = [1, 128], strides = [1, 1]} : vector<1x384xf32> to vector<1x128xf32>
    %75 = vector.extract_strided_slice %72 {offsets = [0, 0], sizes = [1, 128], strides = [1, 1]} : vector<1x384xf32> to vector<1x128xf32>
    %76 = arith.addf %74, %75 : vector<1x128xf32>
    %77 = arith.negf %76 : vector<1x128xf32>
    %78 = math.exp %77 : vector<1x128xf32>
    %cst_26 = arith.constant 1.000000e+00 : f32
    %79 = vector.broadcast %cst_26 : f32 to vector<1x128xf32>
    %80 = arith.addf %79, %78 : vector<1x128xf32>
    %81 = arith.divf %79, %80 : vector<1x128xf32>
    %82 = vector.extract_strided_slice %73 {offsets = [0, 128], sizes = [1, 128], strides = [1, 1]} : vector<1x384xf32> to vector<1x128xf32>
    %83 = vector.extract_strided_slice %72 {offsets = [0, 128], sizes = [1, 128], strides = [1, 1]} : vector<1x384xf32> to vector<1x128xf32>
    %84 = arith.addf %82, %83 : vector<1x128xf32>
    %85 = arith.negf %84 : vector<1x128xf32>
    %86 = math.exp %85 : vector<1x128xf32>
    %cst_27 = arith.constant 1.000000e+00 : f32
    %87 = vector.broadcast %cst_27 : f32 to vector<1x128xf32>
    %88 = arith.addf %87, %86 : vector<1x128xf32>
    %89 = arith.divf %87, %88 : vector<1x128xf32>
    %90 = vector.extract_strided_slice %73 {offsets = [0, 256], sizes = [1, 128], strides = [1, 1]} : vector<1x384xf32> to vector<1x128xf32>
    %91 = vector.extract_strided_slice %72 {offsets = [0, 256], sizes = [1, 128], strides = [1, 1]} : vector<1x384xf32> to vector<1x128xf32>
    %92 = arith.mulf %81, %91 : vector<1x128xf32>
    %93 = arith.addf %90, %92 : vector<1x128xf32>
    %94 = math.tanh %93 : vector<1x128xf32>
    %cst_28 = arith.constant 1.000000e+00 : f32
    %95 = vector.broadcast %cst_28 : f32 to vector<1x128xf32>
    %96 = arith.subf %95, %89 : vector<1x128xf32>
    %97 = arith.mulf %96, %94 : vector<1x128xf32>
    %98 = arith.mulf %89, %68 : vector<1x128xf32>
    %99 = arith.addf %97, %98 : vector<1x128xf32>
    %c2 = arith.constant 2 : index
    %c0_29 = arith.constant 0 : index
    %100 = vector.load %arg28[%c2, %c0_29] : memref<8x128xf32, #tpu.memory_space<vmem>>, vector<1x128xf32>
    tpu.vector_store %arg28[%c2, %c0_29], %99 {strides = array<i32>} : memref<8x128xf32, #tpu.memory_space<vmem>>, vector<1x128xf32>,
    %c0_30 = arith.constant 0 : index
    %c0_31 = arith.constant 0 : index
    %101 = vector.load %arg28[%c0_30, %c0_31] : memref<8x128xf32, #tpu.memory_space<vmem>>, vector<3x128xf32>
    %cst_32 = arith.constant 0.000000e+00 : f32
    %102 = vector.broadcast %cst_32 : f32 to vector<3x128xf32>
    %103 = arith.maximumf %101, %102 : vector<3x128xf32>
    %c0_33 = arith.constant 0 : index
    %c0_34 = arith.constant 0 : index
    %104 = vector.load %arg5[%c0_33, %c0_34] : memref<128x32xf32, #tpu.memory_space<vmem>>, vector<128x32xf32>
    %cst_35 = arith.constant dense<0.000000e+00> : vector<3x32xf32>
    %105 = tpu.matmul %103, %104, %cst_35 {dimension_numbers = #tpu.dot_dimension_numbers<[1], [0], [0], [1], [0, 0, 1, 1], [], []>} : vector<3x128xf32>, vector<128x32xf32>, vector<3x32xf32> -> vector<3x32xf32>
    %c0_36 = arith.constant 0 : index
    %c0_37 = arith.constant 0 : index
    %106 = vector.load %arg6[%c0_36, %c0_37] : memref<1x32xf32, #tpu.memory_space<vmem>>, vector<1x32xf32>
    %107 = vector.broadcast %106 : vector<1x32xf32> to vector<3x32xf32>
    %108 = arith.addf %105, %107 : vector<3x32xf32>
    %109 = tpu.iota {dimensions = array<i32: 0>} : vector<32x32xi32>
    %110 = tpu.iota {dimensions = array<i32: 1>} : vector<32x32xi32>
    %111 = arith.cmpi eq, %109, %110 : vector<32x32xi32>
    %112 = arith.extui %111 : vector<32x32xi1> to vector<32x32xi32>
    %113 = arith.sitofp %112 : vector<32x32xi32> to vector<32x32xf32>
    %c0_38 = arith.constant 0 : index
    %c0_39 = arith.constant 0 : index
    %114 = vector.load %arg7[%c0_38, %c0_39] : memref<32x32xf32, #tpu.memory_space<vmem>>, vector<32x32xf32>
    %115 = arith.addf %114, %113 : vector<32x32xf32>
    %cst_40 = arith.constant dense<0.000000e+00> : vector<32xf32>
    %116 = vector.multi_reduction <add>, %115, %cst_40 [1] : vector<32x32xf32> to vector<32xf32>
    %117 = vector.shape_cast %116 : vector<32xf32> to vector<32x1xf32>
    %118 = tpu.reciprocal %117 {approx = true} : vector<32x1xf32> -> vector<32x1xf32>
    %119 = vector.broadcast %118 : vector<32x1xf32> to vector<32x32xf32>
    %120 = arith.mulf %115, %119 : vector<32x32xf32>
    %c0_41 = arith.constant 0 : index
    %c0_42 = arith.constant 0 : index
    %121 = vector.load %arg9[%c0_41, %c0_42] : memref<32x32xf32, #tpu.memory_space<vmem>>, vector<32x32xf32>
    %cst_43 = arith.constant dense<0.000000e+00> : vector<32x32xf32>
    %122 = tpu.matmul %120, %121, %cst_43 {dimension_numbers = #tpu.dot_dimension_numbers<[1], [0], [0], [1], [0, 0, 1, 1], [], []>} : vector<32x32xf32>, vector<32x32xf32>, vector<32x32xf32> -> vector<32x32xf32>
    %c0_44 = arith.constant 0 : index
    %c0_45 = arith.constant 0 : index
    %123 = vector.load %arg10[%c0_44, %c0_45] : memref<1x32xf32, #tpu.memory_space<vmem>>, vector<1x32xf32>
    %124 = vector.broadcast %123 : vector<1x32xf32> to vector<32x32xf32>
    %125 = arith.addf %122, %124 : vector<32x32xf32>
    %cst_46 = arith.constant 0.000000e+00 : f32
    %126 = vector.broadcast %cst_46 : f32 to vector<32x32xf32>
    %127 = arith.maximumf %125, %126 : vector<32x32xf32>
    %c0_47 = arith.constant 0 : index
    %c0_48 = arith.constant 0 : index
    %128 = vector.load %arg11[%c0_47, %c0_48] : memref<32x32xf32, #tpu.memory_space<vmem>>, vector<32x32xf32>
    %cst_49 = arith.constant dense<0.000000e+00> : vector<32x32xf32>
    %129 = tpu.matmul %127, %128, %cst_49 {dimension_numbers = #tpu.dot_dimension_numbers<[1], [0], [0], [1], [0, 0, 1, 1], [], []>} : vector<32x32xf32>, vector<32x32xf32>, vector<32x32xf32> -> vector<32x32xf32>
    %cst_50 = arith.constant dense<0.000000e+00> : vector<32x32xf32>
    %130 = tpu.matmul %120, %129, %cst_50 {dimension_numbers = #tpu.dot_dimension_numbers<[1], [0], [0], [1], [0, 0, 1, 1], [], []>} : vector<32x32xf32>, vector<32x32xf32>, vector<32x32xf32> -> vector<32x32xf32>
    %c0_51 = arith.constant 0 : index
    %c0_52 = arith.constant 0 : index
    %131 = vector.load %arg12[%c0_51, %c0_52] : memref<1x32xf32, #tpu.memory_space<vmem>>, vector<1x32xf32>
    %132 = vector.broadcast %131 : vector<1x32xf32> to vector<32x32xf32>
    %133 = arith.addf %130, %132 : vector<32x32xf32>
    %c0_53 = arith.constant 0 : index
    %c0_54 = arith.constant 0 : index
    %134 = vector.load %arg13[%c0_53, %c0_54] : memref<32x64xf32, #tpu.memory_space<vmem>>, vector<32x64xf32>
    %c0_55 = arith.constant 0 : index
    %c0_56 = arith.constant 0 : index
    %135 = vector.load %arg8[%c0_55, %c0_56] : memref<32x32xf32, #tpu.memory_space<vmem>>, vector<32x32xf32>
    %cst_57 = arith.constant 0.000000e+00 : f32
    %136 = vector.broadcast %cst_57 : f32 to vector<32x32xf32>
    %137 = vector.extract_strided_slice %134 {offsets = [0, 0], sizes = [32, 32], strides = [1, 1]} : vector<32x64xf32> to vector<32x32xf32>
    %c0_58 = arith.constant 0 : index
    %c0_59 = arith.constant 0 : index
    %138 = vector.load %arg15[%c0_58, %c0_59] : memref<2x32xf32, #tpu.memory_space<vmem>>, vector<1x32xf32>
    %cst_60 = arith.constant dense<0.000000e+00> : vector<32x1xf32>
    %139 = tpu.matmul %137, %138, %cst_60 {dimension_numbers = #tpu.dot_dimension_numbers<[1], [1], [0], [0], [0, 0, 1, 0], [], []>} : vector<32x32xf32>, vector<1x32xf32>, vector<32x1xf32> -> vector<32x1xf32>
    %c0_61 = arith.constant 0 : index
    %c0_62 = arith.constant 0 : index
    %140 = vector.load %arg14[%c0_61, %c0_62] : memref<2x32xf32, #tpu.memory_space<vmem>>, vector<1x32xf32>
    %cst_63 = arith.constant dense<0.000000e+00> : vector<1x32xf32>
    %141 = tpu.matmul %140, %137, %cst_63 {dimension_numbers = #tpu.dot_dimension_numbers<[1], [1], [0], [0], [0, 0, 1, 0], [], []>} : vector<1x32xf32>, vector<32x32xf32>, vector<1x32xf32> -> vector<1x32xf32>
    %142 = vector.broadcast %139 : vector<32x1xf32> to vector<32x32xf32>
    %143 = vector.broadcast %141 : vector<1x32xf32> to vector<32x32xf32>
    %144 = arith.addf %142, %143 : vector<32x32xf32>
    %cst_64 = arith.constant 0.000000e+00 : f32
    %145 = vector.broadcast %cst_64 : f32 to vector<32x32xf32>
    %146 = arith.cmpf ogt, %144, %145 : vector<32x32xf32>
    %cst_65 = arith.constant 2.000000e-01 : f32
    %147 = vector.broadcast %cst_65 : f32 to vector<32x32xf32>
    %148 = arith.mulf %147, %144 : vector<32x32xf32>
    %149 = arith.select %146, %144, %148 : vector<32x32xi1>, vector<32x32xf32>
    %cst_66 = arith.constant 0.000000e+00 : f32
    %150 = vector.broadcast %cst_66 : f32 to vector<32x32xf32>
    %151 = arith.cmpf ogt, %135, %150 : vector<32x32xf32>
    %cst_67 = arith.constant -1.000000e+30 : f32
    %152 = vector.broadcast %cst_67 : f32 to vector<32x32xf32>
    %153 = arith.select %151, %149, %152 : vector<32x32xi1>, vector<32x32xf32>
    %cst_68 = arith.constant dense<0xFF800000> : vector<32xf32>
    %154 = vector.multi_reduction <maximumf>, %153, %cst_68 [1] : vector<32x32xf32> to vector<32xf32>
    %155 = vector.shape_cast %154 : vector<32xf32> to vector<32x1xf32>
    %156 = vector.broadcast %155 : vector<32x1xf32> to vector<32x32xf32>
    %157 = arith.subf %153, %156 : vector<32x32xf32>
    %158 = math.exp %157 : vector<32x32xf32>
    %cst_69 = arith.constant dense<0.000000e+00> : vector<32xf32>
    %159 = vector.multi_reduction <add>, %158, %cst_69 [1] : vector<32x32xf32> to vector<32xf32>
    %160 = vector.shape_cast %159 : vector<32xf32> to vector<32x1xf32>
    %161 = tpu.reciprocal %160 {approx = true} : vector<32x1xf32> -> vector<32x1xf32>
    %162 = vector.broadcast %161 : vector<32x1xf32> to vector<32x32xf32>
    %163 = arith.mulf %158, %162 : vector<32x32xf32>
    %cst_70 = arith.constant dense<0.000000e+00> : vector<32x32xf32>
    %164 = tpu.matmul %163, %137, %cst_70 {dimension_numbers = #tpu.dot_dimension_numbers<[1], [0], [0], [1], [0, 0, 1, 1], [], []>} : vector<32x32xf32>, vector<32x32xf32>, vector<32x32xf32> -> vector<32x32xf32>
    %165 = arith.addf %136, %164 : vector<32x32xf32>
    %166 = vector.extract_strided_slice %134 {offsets = [0, 32], sizes = [32, 32], strides = [1, 1]} : vector<32x64xf32> to vector<32x32xf32>
    %c1_71 = arith.constant 1 : index
    %c0_72 = arith.constant 0 : index
    %167 = vector.load %arg15[%c1_71, %c0_72] : memref<2x32xf32, #tpu.memory_space<vmem>>, vector<1x32xf32>
    %cst_73 = arith.constant dense<0.000000e+00> : vector<32x1xf32>
    %168 = tpu.matmul %166, %167, %cst_73 {dimension_numbers = #tpu.dot_dimension_numbers<[1], [1], [0], [0], [0, 0, 1, 0], [], []>} : vector<32x32xf32>, vector<1x32xf32>, vector<32x1xf32> -> vector<32x1xf32>
    %c1_74 = arith.constant 1 : index
    %c0_75 = arith.constant 0 : index
    %169 = vector.load %arg14[%c1_74, %c0_75] : memref<2x32xf32, #tpu.memory_space<vmem>>, vector<1x32xf32>
    %cst_76 = arith.constant dense<0.000000e+00> : vector<1x32xf32>
    %170 = tpu.matmul %169, %166, %cst_76 {dimension_numbers = #tpu.dot_dimension_numbers<[1], [1], [0], [0], [0, 0, 1, 0], [], []>} : vector<1x32xf32>, vector<32x32xf32>, vector<1x32xf32> -> vector<1x32xf32>
    %171 = vector.broadcast %168 : vector<32x1xf32> to vector<32x32xf32>
    %172 = vector.broadcast %170 : vector<1x32xf32> to vector<32x32xf32>
    %173 = arith.addf %171, %172 : vector<32x32xf32>
    %cst_77 = arith.constant 0.000000e+00 : f32
    %174 = vector.broadcast %cst_77 : f32 to vector<32x32xf32>
    %175 = arith.cmpf ogt, %173, %174 : vector<32x32xf32>
    %cst_78 = arith.constant 2.000000e-01 : f32
    %176 = vector.broadcast %cst_78 : f32 to vector<32x32xf32>
    %177 = arith.mulf %176, %173 : vector<32x32xf32>
    %178 = arith.select %175, %173, %177 : vector<32x32xi1>, vector<32x32xf32>
    %cst_79 = arith.constant 0.000000e+00 : f32
    %179 = vector.broadcast %cst_79 : f32 to vector<32x32xf32>
    %180 = arith.cmpf ogt, %135, %179 : vector<32x32xf32>
    %cst_80 = arith.constant -1.000000e+30 : f32
    %181 = vector.broadcast %cst_80 : f32 to vector<32x32xf32>
    %182 = arith.select %180, %178, %181 : vector<32x32xi1>, vector<32x32xf32>
    %cst_81 = arith.constant dense<0xFF800000> : vector<32xf32>
    %183 = vector.multi_reduction <maximumf>, %182, %cst_81 [1] : vector<32x32xf32> to vector<32xf32>
    %184 = vector.shape_cast %183 : vector<32xf32> to vector<32x1xf32>
    %185 = vector.broadcast %184 : vector<32x1xf32> to vector<32x32xf32>
    %186 = arith.subf %182, %185 : vector<32x32xf32>
    %187 = math.exp %186 : vector<32x32xf32>
    %cst_82 = arith.constant dense<0.000000e+00> : vector<32xf32>
    %188 = vector.multi_reduction <add>, %187, %cst_82 [1] : vector<32x32xf32> to vector<32xf32>
    %189 = vector.shape_cast %188 : vector<32xf32> to vector<32x1xf32>
    %190 = tpu.reciprocal %189 {approx = true} : vector<32x1xf32> -> vector<32x1xf32>
    %191 = vector.broadcast %190 : vector<32x1xf32> to vector<32x32xf32>
    %192 = arith.mulf %187, %191 : vector<32x32xf32>
    %cst_83 = arith.constant dense<0.000000e+00> : vector<32x32xf32>
    %193 = tpu.matmul %192, %166, %cst_83 {dimension_numbers = #tpu.dot_dimension_numbers<[1], [0], [0], [1], [0, 0, 1, 1], [], []>} : vector<32x32xf32>, vector<32x32xf32>, vector<32x32xf32> -> vector<32x32xf32>
    %194 = arith.addf %165, %193 : vector<32x32xf32>
    %cst_84 = arith.constant 5.000000e-01 : f32
    %195 = vector.broadcast %cst_84 : f32 to vector<32x32xf32>
    %196 = arith.mulf %194, %195 : vector<32x32xf32>
    %c0_85 = arith.constant 0 : index
    %c0_86 = arith.constant 0 : index
    %197 = vector.load %arg16[%c0_85, %c0_86] : memref<1x32xf32, #tpu.memory_space<vmem>>, vector<1x32xf32>
    %198 = vector.broadcast %197 : vector<1x32xf32> to vector<32x32xf32>
    %199 = arith.addf %196, %198 : vector<32x32xf32>
    %c0_87 = arith.constant 0 : index
    %200 = memref.load %arg26[%c0_87] : memref<1xf32, #tpu.memory_space<smem>>
    %201 = vector.broadcast %200 : f32 to vector<32x32xf32>
    %202 = arith.mulf %199, %201 : vector<32x32xf32>
    %203 = arith.subf %133, %202 : vector<32x32xf32>
    %204 = vector.extract_strided_slice %108 {offsets = [2, 0], sizes = [1, 32], strides = [1, 1]} : vector<3x32xf32> to vector<1x32xf32>
    %cst_88 = arith.constant dense<0.000000e+00> : vector<1x32xf32>
    %205 = tpu.matmul %204, %203, %cst_88 {dimension_numbers = #tpu.dot_dimension_numbers<[1], [1], [0], [0], [0, 0, 1, 0], [], []>} : vector<1x32xf32>, vector<32x32xf32>, vector<1x32xf32> -> vector<1x32xf32>
    %cst_89 = arith.constant dense<0xFF800000> : vector<1xf32>
    %206 = vector.multi_reduction <maximumf>, %205, %cst_89 [1] : vector<1x32xf32> to vector<1xf32>
    %207 = vector.shape_cast %206 : vector<1xf32> to vector<1x1xf32>
    %208 = vector.broadcast %207 : vector<1x1xf32> to vector<1x32xf32>
    %209 = arith.subf %205, %208 : vector<1x32xf32>
    %210 = math.exp %209 : vector<1x32xf32>
    %cst_90 = arith.constant dense<0.000000e+00> : vector<1xf32>
    %211 = vector.multi_reduction <add>, %210, %cst_90 [1] : vector<1x32xf32> to vector<1xf32>
    %212 = vector.shape_cast %211 : vector<1xf32> to vector<1x1xf32>
    %213 = tpu.reciprocal %212 {approx = true} : vector<1x1xf32> -> vector<1x1xf32>
    %214 = vector.broadcast %213 : vector<1x1xf32> to vector<1x32xf32>
    %215 = arith.mulf %210, %214 : vector<1x32xf32>
    %cst_91 = arith.constant dense<0.000000e+00> : vector<1x32xf32>
    %216 = tpu.matmul %215, %203, %cst_91 {dimension_numbers = #tpu.dot_dimension_numbers<[1], [0], [0], [1], [0, 0, 1, 1], [], []>} : vector<1x32xf32>, vector<32x32xf32>, vector<1x32xf32> -> vector<1x32xf32>
    %217 = vector.extract_strided_slice %108 {offsets = [0, 0], sizes = [2, 32], strides = [1, 1]} : vector<3x32xf32> to vector<2x32xf32>
    %cst_92 = arith.constant dense<0.000000e+00> : vector<1x2xf32>
    %218 = tpu.matmul %204, %217, %cst_92 {dimension_numbers = #tpu.dot_dimension_numbers<[1], [1], [0], [0], [0, 0, 1, 0], [], []>} : vector<1x32xf32>, vector<2x32xf32>, vector<1x2xf32> -> vector<1x2xf32>
    %cst_93 = arith.constant dense<0xFF800000> : vector<1xf32>
    %219 = vector.multi_reduction <maximumf>, %218, %cst_93 [1] : vector<1x2xf32> to vector<1xf32>
    %220 = vector.shape_cast %219 : vector<1xf32> to vector<1x1xf32>
    %221 = vector.broadcast %220 : vector<1x1xf32> to vector<1x2xf32>
    %222 = arith.subf %218, %221 : vector<1x2xf32>
    %223 = math.exp %222 : vector<1x2xf32>
    %cst_94 = arith.constant dense<0.000000e+00> : vector<1xf32>
    %224 = vector.multi_reduction <add>, %223, %cst_94 [1] : vector<1x2xf32> to vector<1xf32>
    %225 = vector.shape_cast %224 : vector<1xf32> to vector<1x1xf32>
    %226 = tpu.reciprocal %225 {approx = true} : vector<1x1xf32> -> vector<1x1xf32>
    %227 = vector.broadcast %226 : vector<1x1xf32> to vector<1x2xf32>
    %228 = arith.mulf %223, %227 : vector<1x2xf32>
    %c0_95 = arith.constant 0 : index
    %c0_96 = arith.constant 0 : index
    %229 = vector.load %arg17[%c0_95, %c0_96] : memref<2x32xf32, #tpu.memory_space<vmem>>, vector<2x32xf32>
    %cst_97 = arith.constant dense<0.000000e+00> : vector<1x32xf32>
    %230 = tpu.matmul %228, %229, %cst_97 {dimension_numbers = #tpu.dot_dimension_numbers<[1], [0], [0], [1], [0, 0, 1, 1], [], []>} : vector<1x2xf32>, vector<2x32xf32>, vector<1x32xf32> -> vector<1x32xf32>
    %cst_98 = arith.constant dense<0.000000e+00> : vector<1x32xf32>
    %231 = tpu.matmul %230, %203, %cst_98 {dimension_numbers = #tpu.dot_dimension_numbers<[1], [0], [0], [1], [0, 0, 1, 1], [], []>} : vector<1x32xf32>, vector<32x32xf32>, vector<1x32xf32> -> vector<1x32xf32>
    %232 = tpu.iota {dimensions = array<i32: 0>} : vector<3x32xi32>
    %c0_i32 = arith.constant 0 : i32
    %233 = vector.broadcast %c0_i32 : i32 to vector<3x32xi32>
    %234 = arith.cmpi eq, %232, %233 : vector<3x32xi32>
    %cst_99 = arith.constant 0.000000e+00 : f32
    %235 = vector.shape_cast %204 : vector<1x32xf32> to vector<1x32xf32>
    %236 = vector.broadcast %235 : vector<1x32xf32> to vector<3x32xf32>
    %237 = vector.broadcast %cst_99 : f32 to vector<3x32xf32>
    %238 = arith.select %234, %236, %237 : vector<3x32xi1>, vector<3x32xf32>
    %c1_i32 = arith.constant 1 : i32
    %239 = vector.broadcast %c1_i32 : i32 to vector<3x32xi32>
    %240 = arith.cmpi eq, %232, %239 : vector<3x32xi32>
    %cst_100 = arith.constant 0.000000e+00 : f32
    %241 = vector.shape_cast %216 : vector<1x32xf32> to vector<1x32xf32>
    %242 = vector.broadcast %241 : vector<1x32xf32> to vector<3x32xf32>
    %243 = vector.broadcast %cst_100 : f32 to vector<3x32xf32>
    %244 = arith.select %240, %242, %243 : vector<3x32xi1>, vector<3x32xf32>
    %245 = arith.addf %238, %244 : vector<3x32xf32>
    %c2_i32 = arith.constant 2 : i32
    %246 = vector.broadcast %c2_i32 : i32 to vector<3x32xi32>
    %247 = arith.cmpi eq, %232, %246 : vector<3x32xi32>
    %cst_101 = arith.constant 0.000000e+00 : f32
    %248 = vector.shape_cast %231 : vector<1x32xf32> to vector<1x32xf32>
    %249 = vector.broadcast %248 : vector<1x32xf32> to vector<3x32xf32>
    %250 = vector.broadcast %cst_101 : f32 to vector<3x32xf32>
    %251 = arith.select %247, %249, %250 : vector<3x32xi1>, vector<3x32xf32>
    %252 = arith.addf %245, %251 : vector<3x32xf32>
    %c0_102 = arith.constant 0 : index
    %c0_103 = arith.constant 0 : index
    %253 = vector.load %arg18[%c0_102, %c0_103] : memref<32x96xf32, #tpu.memory_space<vmem>>, vector<32x96xf32>
    %cst_104 = arith.constant dense<0.000000e+00> : vector<3x96xf32>
    %254 = tpu.matmul %252, %253, %cst_104 {dimension_numbers = #tpu.dot_dimension_numbers<[1], [0], [0], [1], [0, 0, 1, 1], [], []>} : vector<3x32xf32>, vector<32x96xf32>, vector<3x96xf32> -> vector<3x96xf32>
    %c0_105 = arith.constant 0 : index
    %c0_106 = arith.constant 0 : index
    %255 = vector.load %arg19[%c0_105, %c0_106] : memref<1x96xf32, #tpu.memory_space<vmem>>, vector<1x96xf32>
    %256 = vector.broadcast %255 : vector<1x96xf32> to vector<3x96xf32>
    %257 = arith.addf %254, %256 : vector<3x96xf32>
    %258 = vector.extract_strided_slice %257 {offsets = [0, 0], sizes = [3, 32], strides = [1, 1]} : vector<3x96xf32> to vector<3x32xf32>
    %259 = vector.extract_strided_slice %257 {offsets = [0, 32], sizes = [3, 32], strides = [1, 1]} : vector<3x96xf32> to vector<3x32xf32>
    %260 = vector.extract_strided_slice %257 {offsets = [0, 64], sizes = [3, 32], strides = [1, 1]} : vector<3x96xf32> to vector<3x32xf32>
    %c0_107 = arith.constant 0 : index
    %c0_108 = arith.constant 0 : index
    %261 = vector.load %arg20[%c0_107, %c0_108] : memref<32x32xf32, #tpu.memory_space<vmem>>, vector<32x32xf32>
    %c0_109 = arith.constant 0 : index
    %c0_110 = arith.constant 0 : index
    %262 = vector.load %arg21[%c0_109, %c0_110] : memref<1x32xf32, #tpu.memory_space<vmem>>, vector<1x32xf32>
    %263 = vector.extract_strided_slice %258 {offsets = [0, 0], sizes = [3, 16], strides = [1, 1]} : vector<3x32xf32> to vector<3x16xf32>
    %cst_111 = arith.constant 2.500000e-01 : f32
    %264 = vector.broadcast %cst_111 : f32 to vector<3x16xf32>
    %265 = arith.mulf %263, %264 : vector<3x16xf32>
    %266 = vector.extract_strided_slice %259 {offsets = [0, 0], sizes = [3, 16], strides = [1, 1]} : vector<3x32xf32> to vector<3x16xf32>
    %cst_112 = arith.constant dense<0.000000e+00> : vector<3x3xf32>
    %267 = tpu.matmul %265, %266, %cst_112 {dimension_numbers = #tpu.dot_dimension_numbers<[1], [1], [0], [0], [0, 0, 1, 0], [], []>} : vector<3x16xf32>, vector<3x16xf32>, vector<3x3xf32> -> vector<3x3xf32>
    %cst_113 = arith.constant dense<0xFF800000> : vector<3xf32>
    %268 = vector.multi_reduction <maximumf>, %267, %cst_113 [1] : vector<3x3xf32> to vector<3xf32>
    %269 = vector.shape_cast %268 : vector<3xf32> to vector<3x1xf32>
    %270 = vector.broadcast %269 : vector<3x1xf32> to vector<3x3xf32>
    %271 = arith.subf %267, %270 : vector<3x3xf32>
    %272 = math.exp %271 : vector<3x3xf32>
    %cst_114 = arith.constant dense<0.000000e+00> : vector<3xf32>
    %273 = vector.multi_reduction <add>, %272, %cst_114 [1] : vector<3x3xf32> to vector<3xf32>
    %274 = vector.shape_cast %273 : vector<3xf32> to vector<3x1xf32>
    %275 = tpu.reciprocal %274 {approx = true} : vector<3x1xf32> -> vector<3x1xf32>
    %276 = vector.broadcast %275 : vector<3x1xf32> to vector<3x3xf32>
    %277 = arith.mulf %272, %276 : vector<3x3xf32>
    %278 = vector.extract_strided_slice %260 {offsets = [0, 0], sizes = [3, 16], strides = [1, 1]} : vector<3x32xf32> to vector<3x16xf32>
    %cst_115 = arith.constant dense<0.000000e+00> : vector<3x16xf32>
    %279 = tpu.matmul %277, %278, %cst_115 {dimension_numbers = #tpu.dot_dimension_numbers<[1], [0], [0], [1], [0, 0, 1, 1], [], []>} : vector<3x3xf32>, vector<3x16xf32>, vector<3x16xf32> -> vector<3x16xf32>
    %280 = vector.extract_strided_slice %261 {offsets = [0, 0], sizes = [16, 32], strides = [1, 1]} : vector<32x32xf32> to vector<16x32xf32>
    %cst_116 = arith.constant dense<0.000000e+00> : vector<3x32xf32>
    %281 = tpu.matmul %279, %280, %cst_116 {dimension_numbers = #tpu.dot_dimension_numbers<[1], [0], [0], [1], [0, 0, 1, 1], [], []>} : vector<3x16xf32>, vector<16x32xf32>, vector<3x32xf32> -> vector<3x32xf32>
    %282 = vector.broadcast %262 : vector<1x32xf32> to vector<3x32xf32>
    %283 = arith.addf %282, %281 : vector<3x32xf32>
    %284 = vector.extract_strided_slice %258 {offsets = [0, 16], sizes = [3, 16], strides = [1, 1]} : vector<3x32xf32> to vector<3x16xf32>
    %cst_117 = arith.constant 2.500000e-01 : f32
    %285 = vector.broadcast %cst_117 : f32 to vector<3x16xf32>
    %286 = arith.mulf %284, %285 : vector<3x16xf32>
    %287 = vector.extract_strided_slice %259 {offsets = [0, 16], sizes = [3, 16], strides = [1, 1]} : vector<3x32xf32> to vector<3x16xf32>
    %cst_118 = arith.constant dense<0.000000e+00> : vector<3x3xf32>
    %288 = tpu.matmul %286, %287, %cst_118 {dimension_numbers = #tpu.dot_dimension_numbers<[1], [1], [0], [0], [0, 0, 1, 0], [], []>} : vector<3x16xf32>, vector<3x16xf32>, vector<3x3xf32> -> vector<3x3xf32>
    %cst_119 = arith.constant dense<0xFF800000> : vector<3xf32>
    %289 = vector.multi_reduction <maximumf>, %288, %cst_119 [1] : vector<3x3xf32> to vector<3xf32>
    %290 = vector.shape_cast %289 : vector<3xf32> to vector<3x1xf32>
    %291 = vector.broadcast %290 : vector<3x1xf32> to vector<3x3xf32>
    %292 = arith.subf %288, %291 : vector<3x3xf32>
    %293 = math.exp %292 : vector<3x3xf32>
    %cst_120 = arith.constant dense<0.000000e+00> : vector<3xf32>
    %294 = vector.multi_reduction <add>, %293, %cst_120 [1] : vector<3x3xf32> to vector<3xf32>
    %295 = vector.shape_cast %294 : vector<3xf32> to vector<3x1xf32>
    %296 = tpu.reciprocal %295 {approx = true} : vector<3x1xf32> -> vector<3x1xf32>
    %297 = vector.broadcast %296 : vector<3x1xf32> to vector<3x3xf32>
    %298 = arith.mulf %293, %297 : vector<3x3xf32>
    %299 = vector.extract_strided_slice %260 {offsets = [0, 16], sizes = [3, 16], strides = [1, 1]} : vector<3x32xf32> to vector<3x16xf32>
    %cst_121 = arith.constant dense<0.000000e+00> : vector<3x16xf32>
    %300 = tpu.matmul %298, %299, %cst_121 {dimension_numbers = #tpu.dot_dimension_numbers<[1], [0], [0], [1], [0, 0, 1, 1], [], []>} : vector<3x3xf32>, vector<3x16xf32>, vector<3x16xf32> -> vector<3x16xf32>
    %301 = vector.extract_strided_slice %261 {offsets = [16, 0], sizes = [16, 32], strides = [1, 1]} : vector<32x32xf32> to vector<16x32xf32>
    %cst_122 = arith.constant dense<0.000000e+00> : vector<3x32xf32>
    %302 = tpu.matmul %300, %301, %cst_122 {dimension_numbers = #tpu.dot_dimension_numbers<[1], [0], [0], [1], [0, 0, 1, 1], [], []>} : vector<3x16xf32>, vector<16x32xf32>, vector<3x32xf32> -> vector<3x32xf32>
    %303 = arith.addf %283, %302 : vector<3x32xf32>
    %cst_123 = arith.constant dense<0.000000e+00> : vector<32xf32>
    %304 = vector.multi_reduction <add>, %303, %cst_123 [0] : vector<3x32xf32> to vector<32xf32>
    %305 = vector.shape_cast %304 : vector<32xf32> to vector<1x32xf32>
    %cst_124 = arith.constant 3.000000e+00 : f32
    %306 = vector.broadcast %cst_124 : f32 to vector<1x32xf32>
    %307 = arith.divf %305, %306 : vector<1x32xf32>
    %c0_125 = arith.constant 0 : index
    %c0_126 = arith.constant 0 : index
    %308 = vector.load %arg22[%c0_125, %c0_126] : memref<128x64xf32, #tpu.memory_space<vmem>>, vector<128x64xf32>
    %cst_127 = arith.constant 0.000000e+00 : f32
    %309 = vector.broadcast %cst_127 : f32 to vector<1x32xf32>
    %310 = arith.maximumf %204, %309 : vector<1x32xf32>
    %311 = vector.extract_strided_slice %308 {offsets = [0, 0], sizes = [32, 64], strides = [1, 1]} : vector<128x64xf32> to vector<32x64xf32>
    %cst_128 = arith.constant dense<0.000000e+00> : vector<1x64xf32>
    %312 = tpu.matmul %310, %311, %cst_128 {dimension_numbers = #tpu.dot_dimension_numbers<[1], [0], [0], [1], [0, 0, 1, 1], [], []>} : vector<1x32xf32>, vector<32x64xf32>, vector<1x64xf32> -> vector<1x64xf32>
    %cst_129 = arith.constant 0.000000e+00 : f32
    %313 = vector.broadcast %cst_129 : f32 to vector<1x32xf32>
    %314 = arith.maximumf %216, %313 : vector<1x32xf32>
    %315 = vector.extract_strided_slice %308 {offsets = [32, 0], sizes = [32, 64], strides = [1, 1]} : vector<128x64xf32> to vector<32x64xf32>
    %cst_130 = arith.constant dense<0.000000e+00> : vector<1x64xf32>
    %316 = tpu.matmul %314, %315, %cst_130 {dimension_numbers = #tpu.dot_dimension_numbers<[1], [0], [0], [1], [0, 0, 1, 1], [], []>} : vector<1x32xf32>, vector<32x64xf32>, vector<1x64xf32> -> vector<1x64xf32>
    %317 = arith.addf %312, %316 : vector<1x64xf32>
    %cst_131 = arith.constant 0.000000e+00 : f32
    %318 = vector.broadcast %cst_131 : f32 to vector<1x32xf32>
    %319 = arith.maximumf %231, %318 : vector<1x32xf32>
    %320 = vector.extract_strided_slice %308 {offsets = [64, 0], sizes = [32, 64], strides = [1, 1]} : vector<128x64xf32> to vector<32x64xf32>
    %cst_132 = arith.constant dense<0.000000e+00> : vector<1x64xf32>
    %321 = tpu.matmul %319, %320, %cst_132 {dimension_numbers = #tpu.dot_dimension_numbers<[1], [0], [0], [1], [0, 0, 1, 1], [], []>} : vector<1x32xf32>, vector<32x64xf32>, vector<1x64xf32> -> vector<1x64xf32>
    %322 = arith.addf %317, %321 : vector<1x64xf32>
    %cst_133 = arith.constant 0.000000e+00 : f32
    %323 = vector.broadcast %cst_133 : f32 to vector<1x32xf32>
    %324 = arith.maximumf %307, %323 : vector<1x32xf32>
    %325 = vector.extract_strided_slice %308 {offsets = [96, 0], sizes = [32, 64], strides = [1, 1]} : vector<128x64xf32> to vector<32x64xf32>
    %cst_134 = arith.constant dense<0.000000e+00> : vector<1x64xf32>
    %326 = tpu.matmul %324, %325, %cst_134 {dimension_numbers = #tpu.dot_dimension_numbers<[1], [0], [0], [1], [0, 0, 1, 1], [], []>} : vector<1x32xf32>, vector<32x64xf32>, vector<1x64xf32> -> vector<1x64xf32>
    %327 = arith.addf %322, %326 : vector<1x64xf32>
    %c0_135 = arith.constant 0 : index
    %c0_136 = arith.constant 0 : index
    %328 = vector.load %arg23[%c0_135, %c0_136] : memref<1x64xf32, #tpu.memory_space<vmem>>, vector<1x64xf32>
    %329 = arith.addf %327, %328 : vector<1x64xf32>
    %cst_137 = arith.constant 0.000000e+00 : f32
    %330 = vector.broadcast %cst_137 : f32 to vector<1x64xf32>
    %331 = arith.maximumf %329, %330 : vector<1x64xf32>
    %c0_138 = arith.constant 0 : index
    %c0_139 = arith.constant 0 : index
    %332 = vector.load %arg24[%c0_138, %c0_139] : memref<64x32xf32, #tpu.memory_space<vmem>>, vector<64x32xf32>
    %cst_140 = arith.constant dense<0.000000e+00> : vector<1x32xf32>
    %333 = tpu.matmul %331, %332, %cst_140 {dimension_numbers = #tpu.dot_dimension_numbers<[1], [0], [0], [1], [0, 0, 1, 1], [], []>} : vector<1x64xf32>, vector<64x32xf32>, vector<1x32xf32> -> vector<1x32xf32>
    %c0_141 = arith.constant 0 : index
    %c0_142 = arith.constant 0 : index
    %334 = vector.load %arg25[%c0_141, %c0_142] : memref<1x32xf32, #tpu.memory_space<vmem>>, vector<1x32xf32>
    %335 = arith.addf %333, %334 : vector<1x32xf32>
    %c0_143 = arith.constant 0 : index
    %c0_144 = arith.constant 0 : index
    %336 = vector.load %arg27[%c0_143, %c0_144] : memref<1x32xf32, #tpu.memory_space<vmem>>, vector<1x32xf32>
    tpu.vector_store %arg27[%c0_143, %c0_144], %335 {strides = array<i32>} : memref<1x32xf32, #tpu.memory_space<vmem>>, vector<1x32xf32>,
    return
  }
}

</mosaic_0001>

<bundles_post_ra>
// kernel: hermes_kiosk_forward.1
= control target key start
LH: loop header
LB: loop body
LE: loop exit
PB: predicated region body
PF: predicated region fallthrough
CT: control target
= control target key end

     0   :  { %s5838_s0 = inlined_call_operand.vmem [shape: f32[3,64], index: 0, kind: input, shape index: {}]   ;;  %s5839_s1 = inlined_call_operand.vmem [shape: f32[64,384], index: 1, kind: input, shape index: {}]   ;;  %s5840_s2 = inlined_call_operand.vmem [shape: f32[1,384], index: 2, kind: input, shape index: {}]   ;;  %s5841_s3 = inlined_call_operand.vmem [shape: f32[128,384], index: 3, kind: input, shape index: {}]   ;;  %s5842_s4 = inlined_call_operand.vmem [shape: f32[1,384], index: 4, kind: input, shape index: {}]   ;;  %s5843_s5 = inlined_call_operand.vmem [shape: f32[128,32], index: 5, kind: input, shape index: {}]   ;;  %s5844_s6 = inlined_call_operand.vmem [shape: f32[1,32], index: 6, kind: input, shape index: {}]   ;;  %s5845_s7 = inlined_call_operand.vmem [shape: f32[32,32], index: 7, kind: input, shape index: {}]   ;;  %s5846_s8 = inlined_call_operand.vmem [shape: f32[32,32], index: 8, kind: input, shape index: {}]   ;;  %s5847_s9 = inlined_call_operand.vmem [shape: f32[32,32], index: 9, kind: input, shape index: {}]   ;;  %s5848_s10 = inlined_call_operand.vmem [shape: f32[1,32], index: 10, kind: input, shape index: {}]   ;;  %s5849_s11 = inlined_call_operand.vmem [shape: f32[32,32], index: 11, kind: input, shape index: {}]   ;;  %s5850_s12 = inlined_call_operand.vmem [shape: f32[1,32], index: 12, kind: input, shape index: {}]   ;;  %s5851_s13 = inlined_call_operand.vmem [shape: f32[32,64], index: 13, kind: input, shape index: {}]   ;;  %s5852_s14 = inlined_call_operand.vmem [shape: f32[2,32], index: 14, kind: input, shape index: {}]   ;;  %s5853_s15 = inlined_call_operand.vmem [shape: f32[2,32], index: 15, kind: input, shape index: {}]   ;;  %s5854_s16 = inlined_call_operand.vmem [shape: f32[1,32], index: 16, kind: input, shape index: {}]   ;;  %s5855_s17 = inlined_call_operand.vmem [shape: f32[2,32], index: 17, kind: input, shape index: {}]   ;;  %s5856_s18 = inlined_call_operand.vmem [shape: f32[32,96], index: 18, kind: input, shape index: {}]   ;;  %s5857_s19 = inlined_call_operand.hbm [shape: f32[1,96], index: 19, kind: input, shape index: {}]   ;;  %s5858_s20 = inlined_call_operand.vmem [shape: f32[32,32], index: 20, kind: input, shape index: {}]   ;;  %s5859_s21 = inlined_call_operand.vmem [shape: f32[1,32], index: 21, kind: input, shape index: {}]   ;;  %s5860_s22 = inlined_call_operand.vmem [shape: f32[128,64], index: 22, kind: input, shape index: {}]   ;;  %s5861_s23 = inlined_call_operand.vmem [shape: f32[1,64], index: 23, kind: input, shape index: {}]   ;;  %s5862_s24 = inlined_call_operand.vmem [shape: f32[64,32], index: 24, kind: input, shape index: {}]   ;;  %s5863_s25 = inlined_call_operand.vmem [shape: f32[1,32], index: 25, kind: input, shape index: {}]   ;;  %s5864_s26 = inlined_call_operand.<no memory space> [shape: f32[1], index: 26, kind: input, shape index: {}]   ;;  %s5865_s27 = inlined_call_operand.hbm [shape: f32[1,32], index: 27, kind: output, shape index: {}]  }
   0x1   :  { %5873 = sst [smem:[#allocation10_spill]] %s5838_s0 }
   0x2   :  { %5874 = sst [smem:[#allocation11_spill]] %s5839_s1 }
   0x3   :  { %5875 = sst [smem:[#allocation12_spill]] %s5840_s2 }
   0x4   :  { %5876 = sst [smem:[#allocation13_spill]] %s5841_s3 }
   0x5   :  { %5877 = sst [smem:[#allocation14_spill]] %s5842_s4 }
   0x6   :  { %5878 = sst [smem:[#allocation15_spill]] %s5843_s5 }
   0x7   :  { %5879 = sst [smem:[#allocation16_spill]] %s5844_s6 }
   0x8   :  { %5880 = sst [smem:[#allocation17_spill]] %s5845_s7 }
   0x9   :  { %5881 = sst [smem:[#allocation18_spill]] %s5846_s8 }
   0xa   :  { %5882 = sst [smem:[#allocation19_spill]] %s5847_s9 }
   0xb   :  { %5883 = sst [smem:[#allocation20_spill]] %s5848_s10 }
   0xc   :  { %5884 = sst [smem:[#allocation21_spill]] %s5849_s11 }
   0xd   :  { %33 = vsyncpa [#allocation5], 0 }
   0xe   :  { %34 = vsyncpa [#allocation6], 0  ;;  %s4632_s7 = smov [#allocation4]   ;;  %s4584_s9 = scalar_lea.hbm %s5857_s19, 16 }
   0xf   :  { %s79_s4 = sshll.u32 %s4632_s7, 4  ;;  %p4585_p0 = scmp.ne.s32.totalorder %s5857_s19, %s4584_s9  ;;  %s80_s4 = int_to_ptr.vmem [resolvable:$true] %s79_s4 }
  0x10   :  { %p4588_p1 = scmp.lt.u32.totalorder %s4584_s9, %s5857_s19 }
  0x12   :  { %p4590_p2 = pnand %p4588_p1, %p4585_p0 }
  0x14   :  { %4593 = shalt.err (!%p4590_p2)
}
  0x15   :  { %s4594_s29 = scalar_lea.vmem %s80_s4, 16  ;;  %s4598_s1 = scalar_lea.vmem %s80_s4, 32 }
  0x16   :  { %p4595_p3 = scmp.ne.s32.totalorder %s80_s4, %s4594_s29  ;;  %p4599_p4 = scmp.lt.s32.totalorder %s80_s4, %s80_s4 }
  0x17   :  { %p4600_p5 = scmp.lt.s32.totalorder %s4598_s1, %s4594_s29 }
  0x19   :  { %p4601_p6 = por %p4600_p5, %p4599_p4 }
  0x1b   :  { %p4602_p7 = pnand %p4601_p6, %p4595_p3 }
  0x1d   :  { %4605 = shalt.err (!%p4602_p7)
}
  0x1e   :  { %82 = dma.hbm_to_vmem [thread:$0]  %s5857_s19, 16, %s80_s4, [#allocation5]  }
  0x1f   :  { %4628 = dma.done.wait [#allocation5], 16  }
  0x20   :  { %4629 = vsyncadd [#allocation5], 4294967280  ;;  %v4633_v0 = vmov 0.0   ;;  %v4634_v1 = vmov 0.0|0.0   ;;  %vm4635_vm0 = vmmov 0   ;;  %s5885_s7 = sld [smem:[#allocation11_spill]] }
  0x21   :  { %210 = vmatprep.mubr.f32.mxu0 %v4633_v0  ;;  %4142 = vmatprep.subr.bf16.mxu1 %v4634_v1  ;;  %s5886_s9 = sld [smem:[#allocation13_spill]]  ;;  %s5887_s2 = sld [smem:[#allocation10_spill]]  ;;  %vm142_vm1 = vcmask 523264   ;;  %vm1085_vm3 = vcmask 261120  }
  0x22   :  { %3740 = vmatprep.mubr.msk.f32.mxu1 %vm4635_vm0, %v4633_v0  ;;  %s5888_s3 = sld [smem:[#allocation17_spill]]  ;;  %s5889_s10 = sld [smem:[#allocation12_spill]]  ;;  %vm5435_vm7 = vmpackc.low %vm1085_vm3, %vm1085_vm3 }
  0x23   :  { %s5890_s6 = sld [smem:[#allocation14_spill]]  ;;  %s4636_s29 = smov 96  }
  0x24   :  { %s4637_s11 = smov 32   ;;  %s5892_s30 = sld [smem:[#allocation21_spill]] }
  0x25   :  { %s5897_s5 = sld [smem:[#allocation18_spill]]  ;;  %s4641_s0 = smov 48  }
  0x26   :  { %v102_v2 = vld [vmem:[%s5885_s7 + $0x8] sm:$0xff]  ;;  %v105_v3 = vld [vmem:[%s5885_s7 + $0x20] sm:$0xff]  ;;  %v104_v6 = vld [vmem:[%s5885_s7 + $0x18] sm:$0xff] }
  0x27   :  { %v101_v4 = vld [vmem:[%s5885_s7] sm:$0xff]  ;;  %v4126_v5 = vpack.c.bf16 %v105_v3, %v102_v2  ;;  %v108_v7 = vld [vmem:[%s5885_s7 + $0x38] sm:$0xff]  ;;  %v111_v8 = vld [vmem:[%s5885_s7 + $0x50] sm:$0xff] }
  0x28   :  { %v4128_v9 = vpack.c.bf16 %v104_v6, %v101_v4  ;;  %v4130_v10 = vpack.c.bf16 %v111_v8, %v108_v7  ;;  %v107_v11 = vld [vmem:[%s5885_s7 + $0x30] sm:$0xff]  ;;  %v110_v12 = vld [vmem:[%s5885_s7 + $0x48] sm:$0xff]  ;;  %v117_v14 = vld [vmem:[%s5885_s7 + $0x80] sm:$0xff] }
  0x29   :  { %v114_v13 = vld [vmem:[%s5885_s7 + $0x68] sm:$0xff]  ;;  %4127 = vmatprep.subr.bf16.mxu0 %v4126_v5  ;;  %v4132_v15 = vpack.c.bf16 %v110_v12, %v107_v11  ;;  %v113_v17 = vld [vmem:[%s5885_s7 + $0x60] sm:$0xff]  ;;  %v116_v18 = vld [vmem:[%s5885_s7 + $0x78] sm:$0xff] }
  0x2a   :  { %4129 = vmatpush1.bf16.msra.mxu0 %v4128_v9  ;;  %v4134_v16 = vpack.c.bf16 %v117_v14, %v114_v13  ;;  %v120_v19 = vld [vmem:[%s5885_s7 + $0x98] sm:$0xff]  ;;  %v123_v20 = vld [vmem:[%s5885_s7 + $0xb0] sm:$0xff]  ;;  %v4136_v21 = vpack.c.bf16 %v116_v18, %v113_v17  ;;  %v122_v24 = vld [vmem:[%s5885_s7 + $0xa8] sm:$0xff] }
  0x2b   :  { %4131 = vmatprep.subr.bf16.mxu0 %v4130_v10  ;;  %v4138_v22 = vpack.c.bf16 %v123_v20, %v120_v19  ;;  %v119_v23 = vld [vmem:[%s5885_s7 + $0x90] sm:$0xff]  ;;  %v289_v26 = vld [vmem:[%s5886_s9 + $0x8] sm:$0xff]  ;;  %v292_v27 = vld [vmem:[%s5886_s9 + $0x20] sm:$0xff] }
  0x2c   :  { %v103_v25 = vld [vmem:[%s5885_s7 + $0x10] sm:$0xff]  ;;  %v106_v28 = vld [vmem:[%s5885_s7 + $0x28] sm:$0xff]  ;;  %v109_v30 = vld [vmem:[%s5885_s7 + $0x40] sm:$0xff]  ;;  %v4140_v31 = vpack.c.bf16 %v122_v24, %v119_v23  ;;  %v4865_v33 = vpack.c.bf16 %v292_v27, %v289_v26 }
  0x2d   :  { %v4143_v29 = vpack.c.bf16 %v106_v28, %v103_v25  ;;  %v112_v32 = vld [vmem:[%s5885_s7 + $0x58] sm:$0xff]  ;;  %v288_v34 = vld [vmem:[%s5886_s9] sm:$0xff]  ;;  %v298_v38 = vld [vmem:[%s5886_s9 + $0x50] sm:$0xff] }
  0x2e   :  { %4133 = vmatpush1.bf16.msra.mxu0 %v4132_v15  ;;  %v291_v35 = vld [vmem:[%s5886_s9 + $0x18] sm:$0xff]  ;;  %v4146_v37 = vpack.c.bf16 %v112_v32, %v109_v30  ;;  %v115_v39 = vld [vmem:[%s5885_s7 + $0x70] sm:$0xff]  ;;  %v118_v40 = vld [vmem:[%s5885_s7 + $0x88] sm:$0xff] }
  0x2f   :  { %4135 = vmatprep.subr.bf16.mxu0 %v4134_v16  ;;  %v295_v36 = vld [vmem:[%s5886_s9 + $0x38] sm:$0xff]  ;;  %4144 = vmatpush3.bf16.msra.mxu1 %v4143_v29  ;;  %v100_v41 = vld [vmem:[%s5887_s2] sm:$0x7]  ;;  %v4889_v42 = vpack.c.bf16 %v291_v35, %v288_v34  ;;  %v294_v44 = vld [vmem:[%s5886_s9 + $0x30] sm:$0xff]  ;;  %v4149_v47 = vpack.c.bf16 %v118_v40, %v115_v39  ;;  %s5891_s2 = sld [smem:[#allocation19_spill]] }
  0x30   :  { %4145 = vmatprep.subr.bf16.mxu1 %v4634_v1  ;;  %v4892_v43 = vpack.c.bf16 %v298_v38, %v295_v36  ;;  %v297_v45 = vld [vmem:[%s5886_s9 + $0x48] sm:$0xff]  ;;  %v304_v48 = vld [vmem:[%s5886_s9 + $0x80] sm:$0xff]  ;;  %v124_v50 = vld [vmem:[%s5885_s7 + $0xb8] sm:$0xff] }
  0x31   :  { %v301_v46 = vld [vmem:[%s5886_s9 + $0x68] sm:$0xff]  ;;  %v121_v49 = vld [vmem:[%s5885_s7 + $0xa0] sm:$0xff]  ;;  %v4915_v51 = vpack.c.bf16 %v297_v45, %v294_v44  ;;  %v303_v54 = vld [vmem:[%s5886_s9 + $0x78] sm:$0xff]  ;;  %s4642_s7 = smov [#allocation7]  }
  0x32   :  { %4137 = vmatpush1.bf16.msra.mxu0 %v4136_v21  ;;  %v4919_v52 = vpack.c.bf16 %v304_v48, %v301_v46  ;;  %v300_v53 = vld [vmem:[%s5886_s9 + $0x60] sm:$0xff]  ;;  %v307_v55 = vld [vmem:[%s5886_s9 + $0x98] sm:$0xff]  ;;  %v4152_v56 = vpack.c.bf16 %v124_v50, %v121_v49  ;;  %v310_v57 = vld [vmem:[%s5886_s9 + $0xb0] sm:$0xff] }
  0x33   :  { %4139 = vmatprep.subr.bf16.mxu0 %v4138_v22  ;;  %4147 = vmatpush3.bf16.msra.mxu1 %v4146_v37  ;;  %v290_v58 = vld [vmem:[%s5886_s9 + $0x10] sm:$0xff]  ;;  %v293_v59 = vld [vmem:[%s5886_s9 + $0x28] sm:$0xff]  ;;  %v4941_v60 = vpack.c.bf16 %v303_v54, %v300_v53  ;;  %v4944_v61 = vpack.c.bf16 %v310_v57, %v307_v55  ;;  %v316_v4 = vld [vmem:[%s5886_s9 + $0xe0] sm:$0xff]  ;;  %v127_v54 = vlaneseq }
  0x34   :  { %4148 = vmatprep.subr.bf16.mxu1 %v4634_v1  ;;  %v306_v62 = vld [vmem:[%s5886_s9 + $0x90] sm:$0xff]  ;;  %v309_v63 = vld [vmem:[%s5886_s9 + $0xa8] sm:$0xff]  ;;  %v4955_v3 = vpack.c.bf16 %v293_v59, %v290_v58  ;;  %v296_v5 = vld [vmem:[%s5886_s9 + $0x40] sm:$0xff] }
  0x35   :  { %v313_v2 = vld [vmem:[%s5886_s9 + $0xc8] sm:$0xff]  ;;  %v299_v6 = vld [vmem:[%s5886_s9 + $0x58] sm:$0xff]  ;;  %v4968_v7 = vpack.c.bf16 %v309_v63, %v306_v62  ;;  %v312_v9 = vld [vmem:[%s5886_s9 + $0xc0] sm:$0xff]  ;;  %v5145_v55 = vshrl.u32 %v127_v54, 7 }
  0x36   :  { %4141 = vmatpush1.bf16.msra.mxu0 %v4140_v31  ;;  %v4972_v8 = vpack.c.bf16 %v316_v4, %v313_v2  ;;  %v315_v10 = vld [vmem:[%s5886_s9 + $0xd8] sm:$0xff]  ;;  %v4984_v12 = vpack.c.bf16 %v299_v6, %v296_v5  ;;  %v322_v13 = vld [vmem:[%s5886_s9 + $0x110] sm:$0xff]  ;;  %v305_v15 = vld [vmem:[%s5886_s9 + $0x88] sm:$0xff] }
  0x37   :  { %4155 = vmatprep.subr.bf16.mxu0 %v4865_v33  ;;  %4150 = vmatpush3.bf16.msra.mxu1 %v4149_v47  ;;  %v319_v11 = vld [vmem:[%s5886_s9 + $0xf8] sm:$0xff]  ;;  %v302_v14 = vld [vmem:[%s5886_s9 + $0x70] sm:$0xff]  ;;  %v4999_v16 = vpack.c.bf16 %v315_v10, %v312_v9  ;;  %v321_v19 = vld [vmem:[%s5886_s9 + $0x108] sm:$0xff]  ;;  %v1061_v57 = vadd.s32 16, %v5145_v55  ;;  %v1060_v58 = vadd.s32 8, %v5145_v55  ;;  %v1062_v63 = vadd.s32 24, %v5145_v55 }
  0x38   :  { %4151 = vmatprep.subr.bf16.mxu1 %v4634_v1  ;;  %v5002_v17 = vpack.c.bf16 %v322_v13, %v319_v11  ;;  %v318_v18 = vld [vmem:[%s5886_s9 + $0xf0] sm:$0xff]  ;;  %v325_v20 = vld [vmem:[%s5886_s9 + $0x128] sm:$0xff]  ;;  %v5014_v21 = vpack.c.bf16 %v305_v15, %v302_v14  ;;  %v328_v22 = vld [vmem:[%s5886_s9 + $0x140] sm:$0xff] }
  0x39   :  { %3453 = vmatmul.mubr.msk.f32.vlgmr.msra.gmra.mrb[0].mxu0 %vm142_vm1, %v100_v41  ;;  %v308_v23 = vld [vmem:[%s5886_s9 + $0xa0] sm:$0xff]  ;;  %v311_v24 = vld [vmem:[%s5886_s9 + $0xb8] sm:$0xff]  ;;  %v5027_v25 = vpack.c.bf16 %v321_v19, %v318_v18  ;;  %v5030_v26 = vpack.c.bf16 %v328_v22, %v325_v20  ;;  %v334_v31 = vld [vmem:[%s5886_s9 + $0x170] sm:$0xff] }
  0x3a   :  { %4157 = vmatpush1.bf16.msra.mxu0 %v4889_v42  ;;  %416 = vmatprep.mubr.f32.mxu0 %v4633_v0  ;;  %v324_v27 = vld [vmem:[%s5886_s9 + $0x120] sm:$0xff]  ;;  %v327_v28 = vld [vmem:[%s5886_s9 + $0x138] sm:$0xff]  ;;  %v5042_v30 = vpack.c.bf16 %v311_v24, %v308_v23  ;;  %v314_v32 = vld [vmem:[%s5886_s9 + $0xd0] sm:$0xff] }
  0x3b   :  { %4159 = vmatprep.subr.bf16.mxu0 %v4892_v43  ;;  %4153 = vmatpush3.bf16.msra.mxu1 %v4152_v56  ;;  %v331_v29 = vld [vmem:[%s5886_s9 + $0x158] sm:$0xff]  ;;  %v317_v34 = vld [vmem:[%s5886_s9 + $0xe8] sm:$0xff]  ;;  %v5055_v35 = vpack.c.bf16 %v327_v28, %v324_v27  ;;  %v330_v37 = vld [vmem:[%s5886_s9 + $0x150] sm:$0xff]  ;;  %v1064_v56 = vand.u32 127, %v127_v54  ;;  %v5184_v28 = vsub.s32 0, %v5145_v55 }
  0x3c   :  { %4186 = vmatprep.subr.bf16.mxu1 %v4634_v1  ;;  %v5058_v36 = vpack.c.bf16 %v334_v31, %v331_v29  ;;  %v333_v38 = vld [vmem:[%s5886_s9 + $0x168] sm:$0xff]  ;;  %v5067_v39 = vpack.c.bf16 %v317_v34, %v314_v32  ;;  %v320_v40 = vld [vmem:[%s5886_s9 + $0x100] sm:$0xff]  ;;  %v326_v46 = vld [vmem:[%s5886_s9 + $0x130] sm:$0xff]  ;;  %v133_v32 = vsub.s32 1, %v5145_v55 }
  0x3d   :  { %v5077_v44 = vpack.c.bf16 %v333_v38, %v330_v37  ;;  %v329_v47 = vld [vmem:[%s5886_s9 + $0x148] sm:$0xff]  ;;  %v332_v49 = vld [vmem:[%s5886_s9 + $0x160] sm:$0xff]  ;;  %v335_v50 = vld [vmem:[%s5886_s9 + $0x178] sm:$0xff]  ;;  %vm1065_vm2 = vcmp.eq.s32.totalorder %v5145_v55, %v1064_v56  ;;  %vm1067_vm4 = vcmp.eq.s32.totalorder %v1061_v57, %v1064_v56  ;;  %vm1066_vm5 = vcmp.eq.s32.totalorder %v1060_v58, %v1064_v56 }
  0x3e   :  { %4161 = vmatpush1.bf16.msra.mxu0 %v4915_v51  ;;  %3741 = vmatmul.mubr.msk.f32.vlgmr.msra.gmra.mrb[0].mxu1 %vm142_vm1, %v100_v41  ;;  %v323_v41 = vld [vmem:[%s5886_s9 + $0x118] sm:$0xff]  ;;  %v5092_v48 = vpack.c.bf16 %v329_v47, %v326_v46  ;;  %v5106_v53 = vpack.c.bf16 %v335_v50, %v332_v49  ;;  %v1079_v59 = vld [vmem:[%s5888_s3 + $0x10] sm:$0xff]  ;;  %v1078_v62 = vld [vmem:[%s5888_s3 + $0x8] sm:$0xff]  ;;  %v3462_v4 = vsel %vm1065_vm2, 1.0, %v4633_v0  ;;  %v3464_v5 = vsel %vm1067_vm4, 1.0, %v4633_v0  ;;  %s5894_s9 = sld [smem:[#allocation20_spill]] }
  0x3f   :  { %4163 = vmatprep.subr.bf16.mxu0 %v4919_v52  ;;  %4188 = vmatpush3.bf16.msra.mxu1 %v4955_v3  ;;  %v5081_v45 = vpack.c.bf16 %v323_v41, %v320_v40  ;;  %v1080_v2 = vld [vmem:[%s5888_s3 + $0x18] sm:$0xff]  ;;  %v3463_v6 = vsel %vm1066_vm5, 1.0, %v4633_v0  ;;  %vm1068_vm6 = vcmp.eq.s32.totalorder %v1062_v63, %v1064_v56  ;;  %v5168_v10 = vadd.f32 %v3464_v5, %v1079_v59  ;;  %v125_v29 = vld [vmem:[%s5889_s10] sm:$0x7]  ;;  %s4639_s10 = smov 112  }
  0x40   :  { %4189 = vmatprep.subr.bf16.mxu1 %v4634_v1  ;;  %3775 = vmatprep.mubr.msk.f32.mxu1 %vm4635_vm0, %v4633_v0  ;;  %v5170_v11 = vadd.f32 %v3463_v6, %v1078_v62  ;;  %v3465_v13 = vsel %vm1068_vm6, 1.0, %v4633_v0  ;;  %v287_v31 = vld [vmem:[%s5890_s6] sm:$0x7]  ;;  %v130_v34 = vrot.slane %v125_v29, %v5184_v28  ;;  %v134_v40 = vrot.slane %v125_v29, %v133_v32 }
  0x41   :  { %v5173_v14 = vadd.f32 %v3465_v13, %v1080_v2  ;;  %v1092_v18 = vsel %vm1085_vm3, %v5168_v10, 0.0  ;;  %v5195_v37 = vrot.slane %v287_v31, %v5184_v28  ;;  %v5197_v38 = vrot.slane %v287_v31, %v133_v32 }
  0x42   :  { %4165 = vmatpush1.bf16.msra.mxu0 %v4941_v60  ;;  %1093 = vadd.xlane.f32.xlu1 %v1092_v18  ;;  %v1089_v19 = vsel %vm1085_vm3, %v5170_v11, 0.0 }
  0x43   :  { %4167 = vmatprep.subr.bf16.mxu0 %v4944_v61  ;;  %4191 = vmatpush3.bf16.msra.mxu1 %v4984_v12  ;;  %v1095_v20 = vsel %vm1085_vm3, %v5173_v14, 0.0 }
  0x44   :  { %4192 = vmatprep.subr.bf16.mxu1 %v4634_v1 }
  0x46   :  { %4169 = vmatpush1.bf16.msra.mxu0 %v4968_v7  ;;  %1096 = vadd.xlane.f32.xlu1 %v1095_v20 }
  0x47   :  { %4171 = vmatprep.subr.bf16.mxu0 %v4972_v8  ;;  %4194 = vmatpush3.bf16.msra.mxu1 %v5014_v21 }
  0x48   :  { %4195 = vmatprep.subr.bf16.mxu1 %v4634_v1 }
  0x4a   :  { %4173 = vmatpush1.bf16.msra.mxu0 %v4999_v16 }
  0x4b   :  { %4175 = vmatprep.subr.bf16.mxu0 %v5002_v17  ;;  %4197 = vmatpush3.bf16.msra.mxu1 %v5042_v30 }
  0x4c   :  { %4198 = vmatprep.subr.bf16.mxu1 %v4634_v1 }
  0x4e   :  { %4177 = vmatpush1.bf16.msra.mxu0 %v5027_v25 }
  0x4f   :  { %4179 = vmatprep.subr.bf16.mxu0 %v5030_v26  ;;  %4200 = vmatpush3.bf16.msra.mxu1 %v5067_v39 }
  0x50   :  { %4201 = vmatprep.subr.bf16.mxu1 %v4634_v1 }
  0x52   :  { %4181 = vmatpush1.bf16.msra.mxu0 %v5055_v35 }
  0x53   :  { %4183 = vmatprep.subr.bf16.mxu0 %v5058_v36  ;;  %4203 = vmatpush3.bf16.msra.mxu1 %v5081_v45 }
  0x54   :  { %4204 = vmatprep.subr.bf16.mxu1 %v4634_v1 }
  0x56   :  { %4185 = vmatpush1.bf16.msra.mxu0 %v5077_v44 }
  0x57   :  { %4211 = vmatprep.subr.bf16.mxu0 %v4865_v33  ;;  %4206 = vmatpush3.bf16.msra.mxu1 %v5092_v48 }
  0x58   :  { %4207 = vmatprep.subr.bf16.mxu1 %v4634_v1 }
  0x59   :  { %417 = vmatmul.mubr.f32.vlgmr.msra.gmra.mrb[2].mxu0 %v4633_v0 }
  0x5a   :  { %4213 = vmatpush1.bf16.msra.mxu0 %v4889_v42  ;;  %627 = vmatprep.mubr.f32.mxu0 %v4633_v0 }
  0x5b   :  { %4215 = vmatprep.subr.bf16.mxu0 %v4892_v43  ;;  %4209 = vmatpush3.bf16.msra.mxu1 %v5106_v53 }
  0x5c   :  { %4242 = vmatprep.subr.bf16.mxu1 %v4634_v1 }
  0x5e   :  { %4217 = vmatpush1.bf16.msra.mxu0 %v4915_v51  ;;  %3776 = vmatmul.mubr.f32.vlgmr.msra.gmra.mrb[2].mxu1 %v4633_v0 }
  0x5f   :  { %4219 = vmatprep.subr.bf16.mxu0 %v4919_v52  ;;  %4244 = vmatpush3.bf16.msra.mxu1 %v4955_v3 }
  0x60   :  { %4245 = vmatprep.subr.bf16.mxu1 %v4634_v1  ;;  %3810 = vmatprep.mubr.msk.f32.mxu1 %vm4635_vm0, %v4633_v0 }
  0x62   :  { %4221 = vmatpush1.bf16.msra.mxu0 %v4941_v60 }
  0x63   :  { %4223 = vmatprep.subr.bf16.mxu0 %v4944_v61  ;;  %4247 = vmatpush3.bf16.msra.mxu1 %v4984_v12 }
  0x64   :  { %4248 = vmatprep.subr.bf16.mxu1 %v4634_v1 }
  0x66   :  { %4225 = vmatpush1.bf16.msra.mxu0 %v4968_v7 }
  0x67   :  { %4227 = vmatprep.subr.bf16.mxu0 %v4972_v8  ;;  %4250 = vmatpush3.bf16.msra.mxu1 %v5014_v21 }
  0x68   :  { %4251 = vmatprep.subr.bf16.mxu1 %v4634_v1 }
  0x6a   :  { %4229 = vmatpush1.bf16.msra.mxu0 %v4999_v16 }
  0x6b   :  { %4231 = vmatprep.subr.bf16.mxu0 %v5002_v17  ;;  %4253 = vmatpush3.bf16.msra.mxu1 %v5042_v30 }
  0x6c   :  { %4254 = vmatprep.subr.bf16.mxu1 %v4634_v1 }
  0x6e   :  { %4233 = vmatpush1.bf16.msra.mxu0 %v5027_v25 }
  0x6f   :  { %4235 = vmatprep.subr.bf16.mxu0 %v5030_v26  ;;  %4256 = vmatpush3.bf16.msra.mxu1 %v5067_v39 }
  0x70   :  { %4257 = vmatprep.subr.bf16.mxu1 %v4634_v1 }
  0x72   :  { %4237 = vmatpush1.bf16.msra.mxu0 %v5055_v35 }
  0x73   :  { %4239 = vmatprep.subr.bf16.mxu0 %v5058_v36  ;;  %4259 = vmatpush3.bf16.msra.mxu1 %v5081_v45 }
  0x74   :  { %4260 = vmatprep.subr.bf16.mxu1 %v4634_v1 }
  0x76   :  { %4241 = vmatpush1.bf16.msra.mxu0 %v5077_v44 }
  0x77   :  { %4267 = vmatprep.subr.bf16.mxu0 %v4865_v33  ;;  %4262 = vmatpush3.bf16.msra.mxu1 %v5092_v48  ;;  %v1077_v33 = vld [vmem:[%s5888_s3] sm:$0xff] }
  0x78   :  { %4263 = vmatprep.subr.bf16.mxu1 %v4634_v1  ;;  %v5166_v9 = vadd.f32 %v3462_v4, %v1077_v33  ;;  %v5208_v4 = vsub.s32 2, %v5145_v55 }
  0x7a   :  { %v1086_v15 = vsel %vm1085_vm3, %v5166_v9, 0.0  ;;  %v5211_v5 = vrot.slane %v287_v31, %v5208_v4  ;;  %v138_v13 = vrot.slane %v125_v29, %v5208_v4 }
  0x7b   :  { %4265 = vmatpush3.bf16.msra.mxu1 %v5106_v53  ;;  %1087 = vadd.xlane.f32.xlu0 %v1086_v15 }
  0x7c   :  { %4298 = vmatprep.subr.bf16.mxu1 %v4634_v1 }
  0x7f   :  { %1090 = vadd.xlane.f32.xlu0 %v1089_v19 }
 0x10c   :  { %v212_v22 = vpop.f32.mrb[0].mxu0 }
 0x10d   :  { %v214_v23 = vpop.f32.mrb[1].mxu0  ;;  %v5199_v46 = vadd.f32 %v212_v22, %v130_v34 }
 0x10e   :  { %v5204_v56 = vadd.f32 %v214_v23, %v134_v40 }
 0x111   :  { %v283_v24 = vpop.f32.mrb[0].mxu1 }
 0x112   :  { %v3742_v27 = vpop.f32.mrb[1].mxu1  ;;  %v5215_v20 = vadd.f32 %v283_v24, %v138_v13 }
 0x12c   :  { %v418_v41 = vpop.f32.mrb[2].mxu0 }
 0x12d   :  { %v419_v47 = vadd.f32 %v418_v41, %v5195_v37  ;;  %v420_v49 = vpop.f32.mrb[3].mxu0 }
 0x12e   :  { %v421_v50 = vadd.f32 %v420_v49, %v5197_v38 }
 0x12f   :  { %v493_v54 = vadd.f32 %v419_v47, %v5199_v46 }
 0x130   :  { %v500_v58 = vadd.f32 %v421_v50, %v5204_v56 }
 0x131   :  { %v3455_v57 = vmul.f32 -1.442695, %v493_v54  ;;  %v489_v33 = vpop.f32.mrb[2].mxu1 }
 0x132   :  { %v3456_v59 = vmul.f32 -1.442695, %v500_v58  ;;  %v3777_v62 = vpop.f32.mrb[3].mxu1  ;;  %v490_v18 = vadd.f32 %v489_v33, %v5211_v5 }
 0x133   :  { %4498 = vpow2.f32 %v3455_v57 }
 0x134   :  { %4500 = vpow2.f32 %v3456_v59 }
 0x13d   :  { %v4499_v63 = vpop.eup %4498 }
 0x13e   :  { %v497_v2 = vadd.f32 1.0, %v4499_v63  ;;  %v4501_v6 = vpop.eup %4500  ;;  %v1088_v63 = vpop.xlane.xlu0 %1087 }
 0x13f   :  { %v504_v15 = vadd.f32 1.0, %v4501_v6 }
 0x140   :  { %4502 = vrcp.f32 %v497_v2  ;;  %v1094_v2 = vpop.xlane.xlu1 %1093 }
 0x141   :  { %4504 = vrcp.f32 %v504_v15 }
 0x142   :  { %v1091_v6 = vpop.xlane.xlu0 %1090 }
 0x144   :  { %v1097_v13 = vpop.xlane.xlu1 %1096 }
 0x14a   :  { %v4503_v19 = vpop.eup %4502 }
 0x14b   :  { %v507_v22 = vmul.f32 %v4503_v19, %v490_v18  ;;  %v4505_v27 = vpop.eup %4504 }
 0x14c   :  { %v510_v32 = vsub.f32 1.0, %v4505_v27  ;;  %v512_v31 = vmul.f32 0.0, %v4505_v27  ;;  %v1109_v27 = vld [vmem:[%s5891_s2 + $0x18] sm:$0xff] }
 0x14d   :  { %v508_v23 = vadd.f32 %v507_v22, %v5215_v20 }
 0x14f   :  { %4506 = vtanh.f32 %v508_v23  ;;  %v1108_v23 = vld [vmem:[%s5891_s2 + $0x10] sm:$0xff] }
 0x159   :  { %v4507_v34 = vpop.eup %4506 }
 0x15a   :  { %v511_v40 = vmul.f32 %v4507_v34, %v510_v32 }
 0x15c   :  { %v5218_v41 = vadd.f32 %v512_v31, %v511_v40  ;;  %v4350_v31 = vpack.c.bf16 %v1109_v27, %v1108_v23 }
 0x15e   :  { %514 = vst [vmem:[#allocation2] sm:$0x1] %v5218_v41  ;;  %628 = vmatmul.mubr.f32.vlgmr.msra.gmra.mrb[4].mxu0 %v5218_v41  ;;  %3811 = vmatmul.mubr.f32.vlgmr.msra.gmra.mrb[4].mxu1 %v5218_v41  ;;  %v733_v57 = vrot.slane %v5218_v41, 7 }
 0x15f   :  { %4300 = vmatpush3.bf16.msra.mxu1 %v4955_v3  ;;  %4269 = vmatpush1.bf16.msra.mxu0 %v4889_v42  ;;  %v1106_v42 = vld [vmem:[%s5891_s2] sm:$0xff] }
 0x160   :  { %4301 = vmatprep.subr.bf16.mxu1 %v4634_v1  ;;  %4271 = vmatprep.subr.bf16.mxu0 %v4892_v43  ;;  %v1107_v43 = vld [vmem:[%s5891_s2 + $0x8] sm:$0xff]  ;;  %v5281_v3 = vld [vmem:[%s5851_s13] sm:$0xff] }
 0x161   :  { %853 = vmatprep.mubr.f32.mxu0 %v4633_v0  ;;  %3845 = vmatprep.mubr.msk.f32.mxu1 %vm4635_vm0, %v4633_v0 }
 0x163   :  { %4303 = vmatpush3.bf16.msra.mxu1 %v4984_v12  ;;  %4273 = vmatpush1.bf16.msra.mxu0 %v4915_v51  ;;  %v5263_v51 = vpack.c.bf16 %v1107_v43, %v1106_v42  ;;  %v3486_v12 = vld [vmem:[%s5853_s15 + $0x1] ss:$0 sm:$0xff] }
 0x164   :  { %4304 = vmatprep.subr.bf16.mxu1 %v4634_v1  ;;  %4275 = vmatprep.subr.bf16.mxu0 %v4919_v52  ;;  %v5269_v52 = vld [vmem:[%s5851_s13 + $0x10] sm:$0xff] }
 0x167   :  { %4306 = vmatpush3.bf16.msra.mxu1 %v5014_v21  ;;  %4277 = vmatpush1.bf16.msra.mxu0 %v4941_v60  ;;  %v5274_v60 = vld [vmem:[%s5851_s13 + $0x18] sm:$0xff] }
 0x168   :  { %4307 = vmatprep.subr.bf16.mxu1 %v4634_v1  ;;  %4279 = vmatprep.subr.bf16.mxu0 %v4944_v61  ;;  %v4493_v61 = vpack.i.bf16 %v5274_v60, %v5269_v52 }
 0x16a   :  { %4494 = vrot.lane.b32.xlu1 %v4493_v61, %s4636_s29 }
 0x16b   :  { %4309 = vmatpush3.bf16.msra.mxu1 %v5042_v30  ;;  %4281 = vmatpush1.bf16.msra.mxu0 %v4968_v7  ;;  %v5286_v7 = vld [vmem:[%s5851_s13 + $0x8] sm:$0xff] }
 0x16c   :  { %4310 = vmatprep.subr.bf16.mxu1 %v4634_v1  ;;  %4283 = vmatprep.subr.bf16.mxu0 %v4972_v8  ;;  %v4488_v8 = vpack.i.bf16 %v5286_v7, %v5281_v3 }
 0x16e   :  { %4489 = vrot.lane.b32.xlu0 %v4488_v8, %s4636_s29  ;;  %1604 = vrot.lane.b32.xlu1 %v3486_v12, %s4637_s11  ;;  %v1221_v12 = vld [vmem:[%s5892_s30 + $0x18] sm:$0xff]  ;;  %s5893_s11 = sld [smem:[#allocation15_spill]] }
 0x16f   :  { %4312 = vmatpush3.bf16.msra.mxu1 %v5067_v39  ;;  %4285 = vmatpush1.bf16.msra.mxu0 %v4999_v16 }
 0x170   :  { %4313 = vmatprep.subr.bf16.mxu1 %v4634_v1  ;;  %4287 = vmatprep.subr.bf16.mxu0 %v5002_v17 }
 0x173   :  { %4315 = vmatpush3.bf16.msra.mxu1 %v5081_v45  ;;  %4289 = vmatpush1.bf16.msra.mxu0 %v5027_v25 }
 0x174   :  { %4316 = vmatprep.subr.bf16.mxu1 %v4634_v1  ;;  %4291 = vmatprep.subr.bf16.mxu0 %v5030_v26 }
 0x177   :  { %4318 = vmatpush3.bf16.msra.mxu1 %v5092_v48  ;;  %4293 = vmatpush1.bf16.msra.mxu0 %v5055_v35 }
 0x178   :  { %4319 = vmatprep.subr.bf16.mxu1 %v4634_v1  ;;  %4295 = vmatprep.subr.bf16.mxu0 %v5058_v36 }
 0x17b   :  { %4321 = vmatpush3.bf16.msra.mxu1 %v5106_v53  ;;  %4297 = vmatpush1.bf16.msra.mxu0 %v5077_v44 }
 0x17c   :  { %4322 = vmatprep.subr.bf16.mxu0 %v4634_v1  ;;  %4347 = vmatprep.subr.bf16.mxu1 %v5263_v51 }
 0x231   :  { %v629_v16 = vpop.f32.mrb[4].mxu0  ;;  %v700_v17 = vpop.f32.mrb[4].mxu1 }
 0x232   :  { %v630_v21 = vadd.f32 %v629_v16, %v5195_v37  ;;  %v631_v25 = vpop.f32.mrb[5].mxu0  ;;  %v3812_v26 = vpop.f32.mrb[5].mxu1  ;;  %v701_v49 = vadd.f32 %v700_v17, %v5211_v5  ;;  %v965_v17 = vld [vmem:[%s5893_s11] sm:$0xff] }
 0x233   :  { %v632_v30 = vadd.f32 %v631_v25, %v5197_v38  ;;  %v967_v26 = vld [vmem:[%s5893_s11 + $0x10] sm:$0xff] }
 0x234   :  { %v705_v35 = vrot.slane %v630_v21, 7  ;;  %v725_v50 = vrot.slane %v701_v49, 7  ;;  %v966_v21 = vld [vmem:[%s5893_s11 + $0x8] sm:$0xff] }
 0x235   :  { %v715_v36 = vrot.slane %v632_v30, 7  ;;  %v4323_v25 = vpack.c.bf16 %v966_v21, %v965_v17  ;;  %v968_v30 = vld [vmem:[%s5893_s11 + $0x18] sm:$0xff] }
 0x236   :  { %v707_v39 = vadd.f32 %v705_v35, %v5199_v46  ;;  %v4326_v35 = vpack.c.bf16 %v968_v30, %v967_v26 }
 0x237   :  { %v717_v44 = vadd.f32 %v715_v36, %v5204_v56  ;;  %v969_v36 = vld [vmem:[%s5893_s11 + $0x20] sm:$0xff] }
 0x238   :  { %v3457_v45 = vmul.f32 -1.442695, %v707_v39  ;;  %v970_v39 = vld [vmem:[%s5893_s11 + $0x28] sm:$0xff] }
 0x239   :  { %v3458_v48 = vmul.f32 -1.442695, %v717_v44  ;;  %v4329_v44 = vpack.c.bf16 %v970_v39, %v969_v36 }
 0x23a   :  { %4508 = vpow2.f32 %v3457_v45  ;;  %v971_v45 = vld [vmem:[%s5893_s11 + $0x30] sm:$0xff] }
 0x23b   :  { %4510 = vpow2.f32 %v3458_v48  ;;  %v972_v48 = vld [vmem:[%s5893_s11 + $0x38] sm:$0xff] }
 0x244   :  { %v4509_v53 = vpop.eup %4508 }
 0x245   :  { %v4511_v24 = vpop.eup %4510  ;;  %v711_v29 = vadd.f32 1.0, %v4509_v53  ;;  %v4332_v53 = vpack.c.bf16 %v972_v48, %v971_v45 }
 0x246   :  { %v721_v47 = vadd.f32 1.0, %v4511_v24  ;;  %v5374_v24 = vpop.permute.xlu1 %4494 }
 0x247   :  { %4512 = vrcp.f32 %v711_v29  ;;  %v973_v29 = vld [vmem:[%s5893_s11 + $0x40] sm:$0xff] }
 0x248   :  { %4514 = vrcp.f32 %v721_v47  ;;  %v974_v47 = vld [vmem:[%s5893_s11 + $0x48] sm:$0xff] }
 0x249   :  { %v4335_v49 = vpack.c.bf16 %v974_v47, %v973_v29 }
 0x251   :  { %v4513_v54 = vpop.eup %4512 }
 0x252   :  { %v4515_v58 = vpop.eup %4514  ;;  %v727_v33 = vmul.f32 %v4513_v54, %v725_v50  ;;  %v1605_v50 = vpop.permute.xlu1 %1604 }
 0x253   :  { %v735_v59 = vmul.f32 %v4515_v58, %v733_v57  ;;  %v730_v15 = vsub.f32 1.0, %v4515_v58  ;;  %v1607_v54 = vmul.f32 %v1605_v50, %v5281_v3  ;;  %v1608_v57 = vmul.f32 %v1605_v50, %v5286_v7  ;;  %v975_v58 = vld [vmem:[%s5893_s11 + $0x50] sm:$0xff] }
 0x254   :  { %v728_v62 = vadd.f32 %v727_v33, %v5215_v20  ;;  %v976_v33 = vld [vmem:[%s5893_s11 + $0x58] sm:$0xff] }
 0x255   :  { %1615 = vrot.lane.b32.xlu1 %v1607_v54, %s4636_s29  ;;  %1617 = vrot.lane.b32.xlu0 %v1608_v57, %s4636_s29  ;;  %v4490_v57 = vpop.permute.xlu0 %4489 }
 0x256   :  { %4516 = vtanh.f32 %v728_v62  ;;  %v1609_v62 = vmul.f32 %v1605_v50, %v5269_v52 }
 0x257   :  { %4518 = vrcp.f32 %v1088_v63  ;;  %v977_v63 = vld [vmem:[%s5893_s11 + $0x60] sm:$0xff] }
 0x258   :  { %4520 = vrcp.f32 %v1091_v6  ;;  %v1610_v6 = vmul.f32 %v1605_v50, %v5274_v60 }
 0x259   :  { %4522 = vrcp.f32 %v1094_v2  ;;  %v978_v2 = vld [vmem:[%s5893_s11 + $0x68] sm:$0xff]  ;;  %1619 = vrot.lane.b32.xlu1 %v1609_v62, %s4636_s29 }
 0x25a   :  { %4524 = vrcp.f32 %v1097_v13  ;;  %v4341_v13 = vpack.c.bf16 %v978_v2, %v977_v63  ;;  %1621 = vrot.lane.b32.xlu0 %v1610_v6, %s4636_s29 }
 0x260   :  { %v4517_v18 = vpop.eup %4516 }
 0x261   :  { %v4519_v19 = vpop.eup %4518  ;;  %v731_v22 = vmul.f32 %v4517_v18, %v730_v15  ;;  %v979_v15 = vld [vmem:[%s5893_s11 + $0x70] sm:$0xff]  ;;  %v980_v18 = vld [vmem:[%s5893_s11 + $0x78] sm:$0xff] }
 0x262   :  { %v5311_v34 = vmul.f32 %v4519_v19, %v5166_v9  ;;  %v4521_v41 = vpop.eup %4520  ;;  %v4344_v19 = vpack.c.bf16 %v980_v18, %v979_v15 }
 0x263   :  { %v5308_v32 = vadd.f32 %v735_v59, %v731_v22  ;;  %v4523_v42 = vpop.eup %4522  ;;  %v5321_v9 = vmul.f32 %v4521_v41, %v5170_v11  ;;  %v1218_v11 = vld [vmem:[%s5892_s30] sm:$0xff]  ;;  %v4338_v59 = vpack.c.bf16 %v976_v33, %v975_v58 }
 0x264   :  { %v4525_v43 = vpop.eup %4524  ;;  %v5324_v61 = vmul.f32 %v4523_v42, %v5168_v10  ;;  %v1219_v10 = vld [vmem:[%s5892_s30 + $0x8] sm:$0xff] }
 0x265   :  { %737 = vst [vmem:[#allocation2] sm:$0x2] %v5308_v32  ;;  %v787_v40 = vrot.slane %v5308_v32, 1  ;;  %v4354_v8 = vpack.c.bf16 %v1219_v10, %v1218_v11 }
 0x267   :  { %854 = vmatmul.mubr.f32.vlgmr.msra.gmra.mrb[6].mxu0 %v787_v40  ;;  %3846 = vmatmul.mubr.f32.vlgmr.msra.gmra.mrb[6].mxu1 %v787_v40 }
 0x268   :  { %4349 = vmatpush3.bf16.msra.mxu1 %v5263_v51  ;;  %3891 = vmatprep.mubr.msk.f32.mxu1 %vm1085_vm3, %v5311_v34  ;;  %v5329_v51 = vmul.f32 %v4525_v43, %v5173_v14  ;;  %v1220_v14 = vld [vmem:[%s5892_s30 + $0x10] sm:$0xff] }
 0x269   :  { %4351 = vmatprep.subr.bf16.mxu1 %v4350_v31  ;;  %3880 = vmatprep.mubr.msk.f32.mxu0 %vm4635_vm0, %v4633_v0  ;;  %v4358_v16 = vpack.c.bf16 %v1221_v12, %v1220_v14 }
 0x26a   :  { %4324 = vmatpush3.bf16.msra.mxu0 %v4323_v25 }
 0x26b   :  { %4325 = vmatprep.subr.bf16.mxu0 %v4634_v1 }
 0x26c   :  { %4353 = vmatpush3.bf16.msra.mxu1 %v4350_v31 }
 0x26d   :  { %4355 = vmatprep.subr.bf16.mxu1 %v4354_v8 }
 0x26e   :  { %4327 = vmatpush3.bf16.msra.mxu0 %v4326_v35 }
 0x26f   :  { %3892 = vmatmul.mubr.msk.f32.vlgmr.msra.gmra.mrb[8].mxu1 %vm1085_vm3, %v5321_v9  ;;  %4328 = vmatprep.subr.bf16.mxu0 %v4634_v1 }
 0x270   :  { %3894 = vmatprep.mubr.msk.f32.mxu1 %vm1085_vm3, %v5324_v61  ;;  %4357 = vmatpush3.bf16.msra.mxu1 %v4354_v8  ;;  %v3466_v8 = vld [vmem:[%s5894_s9] ss:$0 sm:$0xff] }
 0x271   :  { %4359 = vmatprep.subr.bf16.mxu1 %v4358_v16 }
 0x272   :  { %4330 = vmatpush3.bf16.msra.mxu0 %v4329_v44 }
 0x273   :  { %3895 = vmatmul.mubr.msk.f32.gmra.mrb[10].mxu1 %vm1085_vm3, %v5329_v51  ;;  %4331 = vmatprep.subr.bf16.mxu0 %v4634_v1 }
 0x274   :  { %4361 = vmatpush3.bf16.msra.mxu1 %v4358_v16 }
 0x276   :  { %4333 = vmatpush3.bf16.msra.mxu0 %v4332_v53 }
 0x277   :  { %4334 = vmatprep.subr.bf16.mxu0 %v4634_v1 }
 0x27a   :  { %4336 = vmatpush3.bf16.msra.mxu0 %v4335_v49  ;;  %v958_v49 = vrot.slane %v5308_v32, 7 }
 0x27b   :  { %4337 = vmatprep.subr.bf16.mxu0 %v4634_v1 }
 0x27e   :  { %4339 = vmatpush3.bf16.msra.mxu0 %v4338_v59 }
 0x27f   :  { %4340 = vmatprep.subr.bf16.mxu0 %v4634_v1 }
 0x282   :  { %4342 = vmatpush3.bf16.msra.mxu0 %v4341_v13 }
 0x283   :  { %4343 = vmatprep.subr.bf16.mxu0 %v4634_v1 }
 0x286   :  { %4345 = vmatpush3.bf16.msra.mxu0 %v4344_v19  ;;  %v4492_v19 = vunpack.i.h.bf16 %v4490_v57 }
 0x287   :  { %4378 = vmatprep.subr.bf16.mxu0 %v4634_v1 }
 0x2c7   :  { %v1616_v59 = vpop.permute.xlu1 %1615  ;;  %v1618_v62 = vpop.permute.xlu0 %1617 }
 0x2c8   :  { %v1627_v63 = vsel %vm1085_vm3, %v1616_v59, 0.0 }
 0x2c9   :  { %1628 = vadd.xlane.f32.xlu1 %v1627_v63 }
 0x2cc   :  { %v1622_v2 = vpop.permute.xlu0 %1621 }
 0x2cd   :  { %v1636_v32 = vsel %vm1085_vm3, %v1622_v2, 0.0 }
 0x33a   :  { %v855_v22 = vpop.f32.mrb[6].mxu0  ;;  %v926_v23 = vpop.f32.mrb[6].mxu1 }
 0x33b   :  { %v856_v27 = vadd.f32 %v855_v22, %v5195_v37  ;;  %v857_v40 = vpop.f32.mrb[7].mxu0  ;;  %v3847_v31 = vpop.f32.mrb[7].mxu1  ;;  %v927_v53 = vadd.f32 %v926_v23, %v5211_v5  ;;  %v4491_v22 = vunpack.i.l.bf16 %v4490_v57 }
 0x33c   :  { %v858_v41 = vadd.f32 %v857_v40, %v5197_v38  ;;  %v1620_v5 = vpop.permute.xlu1 %1619 }
 0x33d   :  { %v931_v42 = vrot.slane %v856_v27, 6  ;;  %v951_v29 = vrot.slane %v927_v53, 6  ;;  %v1633_v6 = vsel %vm1085_vm3, %v1620_v5, 0.0  ;;  %v4379_v27 = vpack.c.bf16 %v4492_v19, %v4491_v22  ;;  %v5511_v53 = vld [vmem:[%s5897_s5 + $0x18] sm:$0xff] }
 0x33e   :  { %v941_v43 = vrot.slane %v858_v41, 6  ;;  %v4497_v41 = vunpack.i.h.bf16 %v5374_v24  ;;  %vm1549_vm10 = vcmp.gt.f32.partialorder %v5511_v53, 0.0 }
 0x33f   :  { %v933_v11 = vadd.f32 %v931_v42, %v5199_v46  ;;  %v4496_v42 = vunpack.i.l.bf16 %v5374_v24  ;;  %v3480_v24 = vld [vmem:[%s5853_s15] ss:$0 sm:$0xff]  ;;  %s3444_s15 = sshll.u32 %s4642_s7, 4  ;;  %s3445_s15 = int_to_ptr.vmem [resolvable:$true] %s3444_s15 }
 0x340   :  { %v943_v10 = vadd.f32 %v941_v43, %v5204_v56  ;;  %p4611_p9 = scmp.lt.s32.totalorder %s3445_s15, %s3445_s15 }
 0x341   :  { %v3459_v14 = vmul.f32 -1.442695, %v933_v11  ;;  %v4383_v43 = vpack.c.bf16 %v4497_v41, %v4496_v42  ;;  %v1639_v11 = vld [vmem:[%s5852_s14 + $0x1] sm:$0x1] }
 0x342   :  { %v3460_v12 = vmul.f32 -1.442695, %v943_v10  ;;  %v3893_v16 = vpop.f32.mrb[8].mxu1  ;;  %v1424_v10 = vmul.f32 %v3480_v24, %v5281_v3 }
 0x343   :  { %4526 = vpow2.f32 %v3459_v14  ;;  %v1201_v17 = vadd.f32 %v3893_v16, %v3466_v8  ;;  %v1195_v37 = vpop.f32.mrb[9].mxu1  ;;  %v1425_v14 = vmul.f32 %v3480_v24, %v5286_v7  ;;  %v1427_v16 = vmul.f32 %v3480_v24, %v5274_v60 }
 0x344   :  { %4528 = vpow2.f32 %v3460_v12  ;;  %v1196_v21 = vadd.f32 %v3466_v8, %v1195_v37  ;;  %v1426_v12 = vmul.f32 %v3480_v24, %v5269_v52 }
 0x345   :  { %v1215_v26 = vmax.f32 %v1201_v17, 0.0  ;;  %v1431_v17 = vsel %vm1085_vm3, %v1425_v14, 0.0 }
 0x346   :  { %v1214_v25 = vmax.f32 %v1196_v21, 0.0  ;;  %v3896_v38 = vpop.f32.mrb[10].mxu1  ;;  %v1434_v37 = vsel %vm1085_vm3, %v1426_v12, 0.0  ;;  %v1437_v21 = vsel %vm1085_vm3, %v1427_v16, 0.0 }
 0x347   :  { %v1211_v30 = vadd.f32 %v3896_v38, %v3466_v8  ;;  %v1205_v35 = vpop.f32.mrb[11].mxu1 }
 0x348   :  { %v1206_v46 = vadd.f32 %v3466_v8, %v1205_v35  ;;  %3905 = vmatprep.mubr.msk.f32.mxu1 %vm1085_vm3, %v1214_v25  ;;  %v1428_v8 = vsel %vm1085_vm3, %v1424_v10, 0.0 }
 0x349   :  { %3906 = vmatmul.mubr.msk.f32.vlgmr.msra.gmra.mrb[12].mxu1 %vm1085_vm3, %v1215_v26  ;;  %v1217_v36 = vmax.f32 %v1211_v30, 0.0  ;;  %1429 = vadd.xlane.f32.xlu1 %v1428_v8 }
 0x34a   :  { %v1216_v56 = vmax.f32 %v1206_v46, 0.0 }
 0x34c   :  { %3908 = vmatprep.mubr.msk.f32.mxu1 %vm1085_vm3, %v1216_v56  ;;  %v5473_v56 = vpack.c.bf16 %v5286_v7, %v5281_v3  ;;  %v1440_v3 = vld [vmem:[%s5852_s14] sm:$0x1] }
 0x34d   :  { %v4527_v39 = vpop.eup %4526  ;;  %3909 = vmatmul.mubr.msk.f32.gmra.mrb[14].mxu1 %vm1085_vm3, %v1217_v36  ;;  %1435 = vadd.xlane.f32.xlu1 %v1434_v37 }
 0x34e   :  { %v4529_v44 = vpop.eup %4528  ;;  %v937_v45 = vadd.f32 1.0, %v4527_v39  ;;  %3919 = vmatprep.mubr.msk.f32.mxu1 %vm1085_vm3, %v5311_v34  ;;  %v1630_v34 = vsel %vm1085_vm3, %v1618_v62, 0.0 }
 0x34f   :  { %v947_v48 = vadd.f32 1.0, %v4529_v44  ;;  %1631 = vadd.xlane.f32.xlu0 %v1630_v34  ;;  %v5500_v44 = vld [vmem:[%s5897_s5 + $0x8] sm:$0xff] }
 0x350   :  { %4530 = vrcp.f32 %v937_v45  ;;  %vm1547_vm8 = vcmp.gt.f32.partialorder %v5500_v44, 0.0 }
 0x351   :  { %4532 = vrcp.f32 %v947_v48  ;;  %v5506_v48 = vld [vmem:[%s5897_s5] sm:$0xff] }
 0x352   :  { %vm1546_vm9 = vcmp.gt.f32.partialorder %v5506_v48, 0.0 }
 0x353   :  { %1634 = vadd.xlane.f32.xlu0 %v1633_v6 }
 0x357   :  { %1637 = vadd.xlane.f32.xlu0 %v1636_v32 }
 0x35a   :  { %v4531_v47 = vpop.eup %4530 }
 0x35b   :  { %v4533_v50 = vpop.eup %4532  ;;  %v953_v54 = vmul.f32 %v4531_v47, %v951_v29  ;;  %1432 = vadd.xlane.f32.xlu0 %v1431_v17  ;;  %v5516_v29 = vld [vmem:[%s5897_s5 + $0x10] sm:$0xff] }
 0x35c   :  { %v960_v58 = vmul.f32 %v4533_v50, %v958_v49  ;;  %v956_v13 = vsub.f32 1.0, %v4533_v50  ;;  %vm1548_vm11 = vcmp.gt.f32.partialorder %v5516_v29, 0.0 }
 0x35d   :  { %v954_v33 = vadd.f32 %v953_v54, %v5215_v20 }
 0x35f   :  { %4534 = vtanh.f32 %v954_v33  ;;  %1438 = vadd.xlane.f32.xlu0 %v1437_v21 }
 0x369   :  { %v4535_v15 = vpop.eup %4534 }
 0x36a   :  { %v957_v20 = vmul.f32 %v4535_v15, %v956_v13 }
 0x36c   :  { %v961_v18 = vadd.f32 %v960_v58, %v957_v20 }
 0x36e   :  { %962 = vst [vmem:[#allocation2] sm:$0x4] %v961_v18 }
 0x375   :  { %v963_v23 = vld [vmem:[#allocation2] sm:$0x7] }
 0x376   :  { %v964_v40 = vmax.f32 %v963_v23, 0.0 }
 0x378   :  { %3881 = vmatmul.mubr.f32.vlgmr.msra.gmra.mrb[8].mxu0 %v964_v40 }
 0x379   :  { %4381 = vmatpush3.bf16.xpose.msk.msra.mxu0 %vm5435_vm7, %v4379_v27  ;;  %3944 = vmatprep.mubr.msk.f32.mxu0 %vm4635_vm0, %v4633_v0 }
 0x37a   :  { %4382 = vmatprep.subr.bf16.mxu0 %v4634_v1 }
 0x381   :  { %4385 = vmatpush3.bf16.xpose.msk.msra.mxu0 %vm5435_vm7, %v4383_v43 }
 0x382   :  { %4402 = vmatprep.subr.bf16.mxu0 %v4634_v1 }
 0x388   :  { %3945 = vmatmul.mubr.msk.f32.vlgmr.msra.gmra.mrb[10].mxu0 %vm1085_vm3, %v1639_v11 }
 0x389   :  { %3983 = vmatprep.mubr.msk.f32.mxu0 %vm4635_vm0, %v4633_v0 }
 0x41c   :  { %v3907_v25 = vpop.f32.mrb[12].mxu1 }
 0x41d   :  { %v1300_v38 = vpop.f32.mrb[13].mxu1 }
 0x41e   :  { %v4362_v26 = vpack.c.bf16 %v3907_v25, %v1300_v38 }
 0x420   :  { %v3910_v30 = vpop.f32.mrb[14].mxu1  ;;  %4363 = vmatprep.subr.bf16.mxu1 %v4362_v26 }
 0x421   :  { %v1310_v35 = vpop.f32.mrb[15].mxu1  ;;  %4365 = vmatpush3.bf16.msra.mxu1 %v4362_v26 }
 0x422   :  { %v4366_v46 = vpack.c.bf16 %v3910_v30, %v1310_v35 }
 0x424   :  { %4367 = vmatprep.subr.bf16.mxu1 %v4366_v46 }
 0x425   :  { %4369 = vmatpush3.bf16.msra.mxu1 %v4366_v46 }
 0x426   :  { %4370 = vmatprep.subr.bf16.mxu1 %v4634_v1 }
 0x428   :  { %3920 = vmatmul.mubr.msk.f32.vlgmr.msra.gmra.mrb[16].mxu1 %vm1085_vm3, %v5321_v9  ;;  %v5485_v9 = vpack.c.bf16 %v5274_v60, %v5269_v52  ;;  %v1632_v60 = vpop.xlane.xlu0 %1631 }
 0x429   :  { %3922 = vmatprep.mubr.msk.f32.mxu1 %vm1085_vm3, %v5324_v61 }
 0x42c   :  { %3923 = vmatmul.mubr.msk.f32.gmra.mrb[18].mxu1 %vm1085_vm3, %v5329_v51  ;;  %v1635_v61 = vpop.xlane.xlu0 %1634  ;;  %v1629_v51 = vpop.xlane.xlu1 %1628 }
 0x42d   :  { %3933 = vmatprep.mubr.msk.f32.mxu1 %vm4635_vm0, %v4633_v0 }
 0x42e   :  { %4373 = vmatpush3.bf16.xpose.msk.msra.mxu1 %vm5435_vm7, %v5473_v56 }
 0x42f   :  { %4374 = vmatprep.subr.bf16.mxu1 %v4634_v1 }
 0x430   :  { %v1638_v39 = vpop.xlane.xlu0 %1637  ;;  %v1430_v23 = vpop.xlane.xlu1 %1429 }
 0x434   :  { %v1436_v42 = vpop.xlane.xlu1 %1435 }
 0x436   :  { %4377 = vmatpush3.bf16.xpose.msk.msra.mxu1 %vm5435_vm7, %v5485_v9 }
 0x437   :  { %4387 = vmatprep.subr.bf16.mxu1 %v4379_v27 }
 0x43d   :  { %3934 = vmatmul.mubr.msk.f32.vlgmr.msra.gmra.mrb[20].mxu1 %vm1085_vm3, %v1440_v3 }
 0x43e   :  { %4389 = vmatpush3.bf16.msra.mxu1 %v4379_v27  ;;  %v1433_v27 = vpop.xlane.xlu0 %1432 }
 0x43f   :  { %4391 = vmatprep.subr.bf16.mxu1 %v4383_v43 }
 0x442   :  { %4393 = vmatpush3.bf16.msra.mxu1 %v4383_v43  ;;  %v1439_v11 = vpop.xlane.xlu0 %1438 }
 0x443   :  { %4395 = vmatprep.subr.bf16.mxu1 %v5473_v56 }
 0x44b   :  { %v5495_v7 = vpop.f32.mrb[8].mxu0 }
 0x44c   :  { %v3882_v52 = vpop.f32.mrb[9].mxu0 }
 0x45b   :  { %v1725_v36 = vpop.f32.mrb[10].mxu0 }
 0x45c   :  { %v1732_v45 = vrot.slane %v1725_v36, %v5184_v28  ;;  %v3946_v47 = vpop.f32.mrb[11].mxu0 }
 0x45e   :  { %v1733_v49 = vadd.f32 %v1732_v45, %v1629_v51  ;;  %v1735_v50 = vadd.f32 %v1732_v45, %v1635_v61  ;;  %v1736_v54 = vadd.f32 %v1732_v45, %v1638_v39  ;;  %v1734_v57 = vadd.f32 %v1732_v45, %v1632_v60 }
 0x460   :  { %v1741_v58 = vmul.f32 0.2, %v1733_v49  ;;  %v1743_v33 = vmul.f32 0.2, %v1735_v50  ;;  %v1744_v59 = vmul.f32 0.2, %v1736_v54 }
 0x461   :  { %vm1738_vm12 = vcmp.gt.f32.partialorder %v1734_v57, 0.0  ;;  %v1742_v62 = vmul.f32 0.2, %v1734_v57  ;;  %vm1737_vm13 = vcmp.gt.f32.partialorder %v1733_v49, 0.0  ;;  %vm1740_vm14 = vcmp.gt.f32.partialorder %v1736_v54, 0.0 }
 0x462   :  { %v1745_v34 = vsel %vm1737_vm13, %v1733_v49, %v1741_v58  ;;  %v1748_v63 = vsel %vm1740_vm14, %v1736_v54, %v1744_v59  ;;  %vm1739_vm15 = vcmp.gt.f32.partialorder %v1735_v50, 0.0  ;;  %vm2440_vm13 = vcmp.eq.s32.totalorder %v5145_v55, 2 }
 0x463   :  { %v1746_v5 = vsel %vm1738_vm12, %v1734_v57, %v1742_v62  ;;  %v1749_v2 = vsel %vm1546_vm9, %v1745_v34, -1e+30  ;;  %v1752_v6 = vsel %vm1549_vm10, %v1748_v63, -1e+30  ;;  %v1747_v32 = vsel %vm1739_vm15, %v1735_v50, %v1743_v33 }
 0x464   :  { %v1750_v13 = vsel %vm1547_vm8, %v1746_v5, -1e+30  ;;  %v1753_v15 = vsel %vm1085_vm3, %v1749_v2, -inf  ;;  %v1751_v20 = vsel %vm1548_vm11, %v1747_v32, -1e+30  ;;  %v1762_v22 = vsel %vm1085_vm3, %v1752_v6, -inf }
 0x465   :  { %v1756_v18 = vsel %vm1085_vm3, %v1750_v13, -inf  ;;  %1754 = vmax.xlane.f32.xlu1 %v1753_v15  ;;  %v1759_v19 = vsel %vm1085_vm3, %v1751_v20, -inf  ;;  %vm2427_vm12 = vcmp.eq.s32.totalorder %v5145_v55, 0  ;;  %vm2540_vm14 = vcmask 130048  }
 0x466   :  { %1757 = vmax.xlane.f32.xlu0 %v1756_v18  ;;  %vm2616_vm15 = vcmask 18432  }
 0x469   :  { %1760 = vmax.xlane.f32.xlu1 %v1759_v19 }
 0x46a   :  { %1763 = vmax.xlane.f32.xlu0 %v1762_v22 }
 0x4f2   :  { %v1755_v10 = vpop.xlane.xlu1 %1754 }
 0x4f3   :  { %v1758_v8 = vpop.xlane.xlu0 %1757  ;;  %v1765_v14 = vsub.f32 %v1749_v2, %v1755_v10 }
 0x4f4   :  { %v1766_v16 = vsub.f32 %v1750_v13, %v1758_v8 }
 0x4f5   :  { %v1769_v21 = vmul.f32 1.442695, %v1765_v14 }
 0x4f6   :  { %v1761_v12 = vpop.xlane.xlu1 %1760  ;;  %v1771_v25 = vmul.f32 1.442695, %v1766_v16 }
 0x4f7   :  { %v1764_v17 = vpop.xlane.xlu0 %1763  ;;  %v1767_v37 = vsub.f32 %v1751_v20, %v1761_v12  ;;  %4536 = vpow2.f32 %v1769_v21 }
 0x4f8   :  { %v1768_v38 = vsub.f32 %v1752_v6, %v1764_v17  ;;  %4538 = vpow2.f32 %v1771_v25 }
 0x4f9   :  { %v1773_v26 = vmul.f32 1.442695, %v1767_v37 }
 0x4fa   :  { %v1775_v3 = vmul.f32 1.442695, %v1768_v38 }
 0x4fb   :  { %v5534_v40 = vpop.f32.mrb[16].mxu1  ;;  %4540 = vpow2.f32 %v1773_v26 }
 0x4fc   :  { %v5536_v41 = vpop.f32.mrb[17].mxu1  ;;  %4542 = vpow2.f32 %v1775_v3 }
 0x4ff   :  { %v5538_v43 = vpop.f32.mrb[18].mxu1 }
 0x500   :  { %v5540_v24 = vpop.f32.mrb[19].mxu1 }
 0x501   :  { %v4537_v5 = vpop.eup %4536 }
 0x502   :  { %v4539_v44 = vpop.eup %4538  ;;  %v1777_v15 = vsel %vm1085_vm3, %v4537_v5, 0.0 }
 0x503   :  { %v1780_v13 = vsel %vm1085_vm3, %v4539_v44, 0.0 }
 0x505   :  { %v4541_v6 = vpop.eup %4540 }
 0x506   :  { %v4543_v32 = vpop.eup %4542  ;;  %v1783_v29 = vsel %vm1085_vm3, %v4541_v6, 0.0 }
 0x507   :  { %v1786_v53 = vsel %vm1085_vm3, %v4543_v32, 0.0 }
 0x510   :  { %v1522_v30 = vpop.f32.mrb[20].mxu1 }
 0x511   :  { %v1529_v35 = vrot.slane %v1522_v30, %v5184_v28  ;;  %v3935_v46 = vpop.f32.mrb[21].mxu1 }
 0x513   :  { %v1531_v52 = vadd.f32 %v1529_v35, %v1433_v27  ;;  %v1530_v60 = vadd.f32 %v1529_v35, %v1430_v23  ;;  %v1533_v61 = vadd.f32 %v1529_v35, %v1439_v11  ;;  %v1532_v51 = vadd.f32 %v1529_v35, %v1436_v42 }
 0x515   :  { %vm1535_vm2 = vcmp.gt.f32.partialorder %v1531_v52, 0.0  ;;  %v1539_v36 = vmul.f32 0.2, %v1531_v52  ;;  %vm1534_vm4 = vcmp.gt.f32.partialorder %v1530_v60, 0.0  ;;  %v1538_v39 = vmul.f32 0.2, %v1530_v60 }
 0x516   :  { %vm1537_vm5 = vcmp.gt.f32.partialorder %v1533_v61, 0.0  ;;  %v1541_v45 = vmul.f32 0.2, %v1533_v61  ;;  %vm1536_vm6 = vcmp.gt.f32.partialorder %v1532_v51, 0.0  ;;  %v1540_v47 = vmul.f32 0.2, %v1532_v51 }
 0x517   :  { %v1543_v49 = vsel %vm1535_vm2, %v1531_v52, %v1539_v36  ;;  %v1542_v50 = vsel %vm1534_vm4, %v1530_v60, %v1538_v39  ;;  %vm2634_vm2 = vcmask 1042432   ;;  %vm2630_vm4 = vcmask 23552  }
 0x518   :  { %v1551_v54 = vsel %vm1547_vm8, %v1543_v49, -1e+30  ;;  %v1550_v57 = vsel %vm1546_vm9, %v1542_v50, -1e+30  ;;  %v1545_v58 = vsel %vm1537_vm5, %v1533_v61, %v1541_v45  ;;  %v1544_v33 = vsel %vm1536_vm6, %v1532_v51, %v1540_v47 }
 0x519   :  { %v1557_v59 = vsel %vm1085_vm3, %v1551_v54, -inf  ;;  %v1554_v62 = vsel %vm1085_vm3, %v1550_v57, -inf  ;;  %v1553_v34 = vsel %vm1549_vm10, %v1545_v58, -1e+30  ;;  %v1552_v63 = vsel %vm1548_vm11, %v1544_v33, -1e+30 }
 0x51a   :  { %1558 = vmax.xlane.f32.xlu0 %v1557_v59  ;;  %1555 = vmax.xlane.f32.xlu1 %v1554_v62  ;;  %v1563_v2 = vsel %vm1085_vm3, %v1553_v34, -inf  ;;  %v1560_v48 = vsel %vm1085_vm3, %v1552_v63, -inf  ;;  %vm2106_vm8 = vcmask 253952   ;;  %vm2280_vm9 = vcmask 1041408  }
 0x51b   :  { %vm2276_vm10 = vcmask 15360   ;;  %vm2433_vm11 = vcmp.eq.s32.totalorder %v5145_v55, 1 }
 0x51e   :  { %1564 = vmax.xlane.f32.xlu0 %v1563_v2  ;;  %1561 = vmax.xlane.f32.xlu1 %v1560_v48  ;;  %v3500_v2 = vld [vmem:[%s5854_s16] ss:$0 sm:$0xff] }
 0x522   :  { %1781 = vadd.xlane.f32.xlu0 %v1780_v13  ;;  %1778 = vadd.xlane.f32.xlu1 %v1777_v15  ;;  %v2011_v13 = vstv %s5864_s26  ;;  %s5898_s26 = sld [smem:[#allocation16_spill]] }
 0x526   :  { %1787 = vadd.xlane.f32.xlu0 %v1786_v53  ;;  %1784 = vadd.xlane.f32.xlu1 %v1783_v29 }
 0x5a7   :  { %v1559_v20 = vpop.xlane.xlu0 %1558  ;;  %v1556_v18 = vpop.xlane.xlu1 %1555 }
 0x5a8   :  { %v1567_v19 = vsub.f32 %v1551_v54, %v1559_v20  ;;  %v1566_v22 = vsub.f32 %v1550_v57, %v1556_v18 }
 0x5aa   :  { %v1572_v23 = vmul.f32 1.442695, %v1567_v19  ;;  %v1570_v27 = vmul.f32 1.442695, %v1566_v22 }
 0x5ab   :  { %v1565_v42 = vpop.xlane.xlu0 %1564  ;;  %v1562_v11 = vpop.xlane.xlu1 %1561 }
 0x5ac   :  { %4544 = vpow2.f32 %v1572_v23  ;;  %v1569_v10 = vsub.f32 %v1553_v34, %v1565_v42  ;;  %v1568_v8 = vsub.f32 %v1552_v63, %v1562_v11 }
 0x5ad   :  { %4546 = vpow2.f32 %v1570_v27 }
 0x5ae   :  { %v1576_v14 = vmul.f32 1.442695, %v1569_v10  ;;  %v1574_v12 = vmul.f32 1.442695, %v1568_v8 }
 0x5af   :  { %v1782_v16 = vpop.xlane.xlu0 %1781  ;;  %v1779_v17 = vpop.xlane.xlu1 %1778 }
 0x5b0   :  { %4548 = vpow2.f32 %v1576_v14 }
 0x5b1   :  { %4550 = vpow2.f32 %v1574_v12 }
 0x5b2   :  { %4552 = vrcp.f32 %v1782_v16 }
 0x5b3   :  { %4554 = vrcp.f32 %v1779_v17  ;;  %v1788_v37 = vpop.xlane.xlu0 %1787  ;;  %v1785_v21 = vpop.xlane.xlu1 %1784 }
 0x5b4   :  { %4556 = vrcp.f32 %v1788_v37 }
 0x5b5   :  { %4558 = vrcp.f32 %v1785_v21 }
 0x5b6   :  { %v4545_v25 = vpop.eup %4544 }
 0x5b7   :  { %v4547_v38 = vpop.eup %4546  ;;  %v1581_v26 = vsel %vm1085_vm3, %v4545_v25, 0.0 }
 0x5b8   :  { %1582 = vadd.xlane.f32.xlu0 %v1581_v26  ;;  %v1578_v30 = vsel %vm1085_vm3, %v4547_v38, 0.0 }
 0x5b9   :  { %1579 = vadd.xlane.f32.xlu1 %v1578_v30 }
 0x5ba   :  { %v4549_v35 = vpop.eup %4548 }
 0x5bb   :  { %v4551_v46 = vpop.eup %4550  ;;  %v1587_v3 = vsel %vm1085_vm3, %v4549_v35, 0.0 }
 0x5bc   :  { %v4553_v52 = vpop.eup %4552  ;;  %1588 = vadd.xlane.f32.xlu0 %v1587_v3  ;;  %v1584_v60 = vsel %vm1085_vm3, %v4551_v46, 0.0 }
 0x5bd   :  { %v4555_v61 = vpop.eup %4554  ;;  %v1794_v51 = vmul.f32 %v4553_v52, %v4539_v44  ;;  %1585 = vadd.xlane.f32.xlu1 %v1584_v60 }
 0x5be   :  { %v4557_v36 = vpop.eup %4556  ;;  %v1793_v39 = vmul.f32 %v4555_v61, %v4537_v5 }
 0x5bf   :  { %v4559_v45 = vpop.eup %4558  ;;  %v1796_v49 = vmul.f32 %v4557_v36, %v4543_v32  ;;  %v3475_v32 = vld [vmem:[%s5850_s12] ss:$0 sm:$0xff] }
 0x5c0   :  { %3955 = vmatprep.mubr.msk.f32.mxu1 %vm1085_vm3, %v1793_v39  ;;  %v1795_v47 = vmul.f32 %v4559_v45, %v4541_v6  ;;  %v1398_v18 = vadd.f32 %v5534_v40, %v3475_v32  ;;  %v1393_v27 = vadd.f32 %v3475_v32, %v5536_v41  ;;  %v1408_v16 = vadd.f32 %v5538_v43, %v3475_v32  ;;  %v3461_v43 = vld [vmem:[%s5898_s26] ss:$0 sm:$0xff] }
 0x5c1   :  { %3956 = vmatmul.mubr.msk.f32.vlgmr.msra.gmra.mrb[22].mxu1 %vm1085_vm3, %v1794_v51  ;;  %v1403_v37 = vadd.f32 %v3475_v32, %v5540_v24  ;;  %v5601_v24 = vadd.f32 %v3461_v43, %v5495_v7  ;;  %v2450_v32 = vld [vmem:[%s5856_s18 + $0x18] sm:$0xff] }
 0x5c2   :  { %3958 = vmatprep.mubr.msk.f32.mxu1 %vm1085_vm3, %v1795_v47  ;;  %4397 = vmatpush3.bf16.msra.mxu1 %v5473_v56 }
 0x5c3   :  { %4399 = vmatprep.subr.bf16.mxu1 %v5485_v9  ;;  %v2021_v26 = vrot.slane %v5601_v24, 2 }
 0x5c5   :  { %3959 = vmatmul.mubr.msk.f32.gmra.mrb[24].mxu1 %vm1085_vm3, %v1796_v49 }
 0x5c6   :  { %4401 = vmatpush3.bf16.msra.mxu1 %v5485_v9 }
 0x5c7   :  { %4410 = vmatprep.subr.bf16.mxu1 %v4634_v1 }
 0x645   :  { %v1583_v50 = vpop.xlane.xlu0 %1582 }
 0x646   :  { %4560 = vrcp.f32 %v1583_v50  ;;  %v1580_v54 = vpop.xlane.xlu1 %1579 }
 0x647   :  { %4562 = vrcp.f32 %v1580_v54  ;;  %v2275_v54 = vld [vmem:[%s5855_s17] sm:$0x3] }
 0x649   :  { %v1589_v57 = vpop.xlane.xlu0 %1588 }
 0x64a   :  { %4564 = vrcp.f32 %v1589_v57  ;;  %v1586_v58 = vpop.xlane.xlu1 %1585 }
 0x64b   :  { %4566 = vrcp.f32 %v1586_v58 }
 0x650   :  { %v4561_v33 = vpop.eup %4560 }
 0x651   :  { %v4563_v59 = vpop.eup %4562  ;;  %v1595_v62 = vmul.f32 %v4561_v33, %v4545_v25 }
 0x652   :  { %v1594_v56 = vmul.f32 %v4563_v59, %v4547_v38 }
 0x654   :  { %v4565_v34 = vpop.eup %4564  ;;  %3969 = vmatprep.mubr.msk.f32.mxu1 %vm1085_vm3, %v1594_v56 }
 0x655   :  { %v4567_v63 = vpop.eup %4566  ;;  %3970 = vmatmul.mubr.msk.f32.vlgmr.msra.gmra.mrb[22].mxu1 %vm1085_vm3, %v1595_v62  ;;  %v1597_v9 = vmul.f32 %v4565_v34, %v4549_v35  ;;  %v2447_v34 = vld [vmem:[%s5856_s18] sm:$0xff] }
 0x656   :  { %v1596_v5 = vmul.f32 %v4567_v63, %v4551_v46  ;;  %v2448_v63 = vld [vmem:[%s5856_s18 + $0x8] sm:$0xff] }
 0x658   :  { %3972 = vmatprep.mubr.msk.f32.mxu1 %vm1085_vm3, %v1596_v5 }
 0x659   :  { %3973 = vmatmul.mubr.msk.f32.gmra.mrb[24].mxu1 %vm1085_vm3, %v1597_v9  ;;  %v4423_v9 = vpack.c.bf16 %v2448_v63, %v2447_v34 }
 0x65a   :  { %3994 = vmatprep.mubr.msk.f32.mxu1 %vm4635_vm0, %v4633_v0 }
 0x728   :  { %v3971_v44 = vpop.f32.mrb[22].mxu1 }
 0x729   :  { %v1996_v48 = vmul.f32 0.5, %v3971_v44  ;;  %v1976_v6 = vpop.f32.mrb[23].mxu1 }
 0x72a   :  { %v1995_v15 = vmul.f32 0.5, %v1976_v6  ;;  %v2449_v6 = vld [vmem:[%s5856_s18 + $0x10] sm:$0xff]  ;;  %s4638_s18 = smov 80  }
 0x72b   :  { %v2007_v53 = vadd.f32 %v3500_v2, %v1996_v48 }
 0x72c   :  { %v2006_v29 = vadd.f32 %v3500_v2, %v1995_v15  ;;  %v3974_v20 = vpop.f32.mrb[24].mxu1 }
 0x72d   :  { %v2013_v19 = vmul.f32 %v2011_v13, %v2007_v53  ;;  %v1998_v22 = vmul.f32 0.5, %v3974_v20  ;;  %v1986_v23 = vpop.f32.mrb[25].mxu1  ;;  %v2431_v53 = vrot.slane %v5601_v24, %v5208_v4  ;;  %v3512_v4 = vld [vmem:[#allocation4] ss:$0 sm:$0xff] }
 0x72e   :  { %v2012_v42 = vmul.f32 %v2011_v13, %v2006_v29  ;;  %v1997_v11 = vmul.f32 0.5, %v1986_v23 }
 0x72f   :  { %v2017_v10 = vsub.f32 %v1398_v18, %v2013_v19  ;;  %v2009_v8 = vadd.f32 %v3500_v2, %v1998_v22  ;;  %v2432_v18 = vsel %vm2427_vm12, %v2431_v53, 0.0 }
 0x730   :  { %v2016_v14 = vsub.f32 %v1393_v27, %v2012_v42  ;;  %v2008_v12 = vadd.f32 %v3500_v2, %v1997_v11 }
 0x731   :  { %v2015_v17 = vmul.f32 %v2011_v13, %v2009_v8 }
 0x732   :  { %v4403_v21 = vpack.c.bf16 %v2017_v10, %v2016_v14  ;;  %v2014_v25 = vmul.f32 %v2011_v13, %v2008_v12  ;;  %v4426_v13 = vpack.c.bf16 %v2450_v32, %v2449_v6 }
 0x733   :  { %v2019_v38 = vsub.f32 %v1408_v16, %v2015_v17 }
 0x734   :  { %v2018_v40 = vsub.f32 %v1403_v37, %v2014_v25  ;;  %4405 = vmatpush3.bf16.xpose.msk.msra.mxu0 %vm5435_vm7, %v4403_v21  ;;  %4412 = vmatpush3.bf16.msra.mxu1 %v4403_v21 }
 0x735   :  { %4413 = vmatprep.subr.bf16.mxu1 %v4634_v1  ;;  %4406 = vmatprep.subr.bf16.mxu0 %v4634_v1 }
 0x736   :  { %v4407_v41 = vpack.c.bf16 %v2019_v38, %v2018_v40  ;;  %v2531_v40 = vld [vmem:[%s5858_s20] sm:$0xff] }
 0x738   :  { %4415 = vmatpush3.bf16.msra.mxu1 %v4407_v41 }
 0x739   :  { %4422 = vmatprep.subr.bf16.mxu1 %v4634_v1 }
 0x73c   :  { %4409 = vmatpush3.bf16.xpose.msk.msra.mxu0 %vm5435_vm7, %v4407_v41  ;;  %vm2263_vm7 = vcmask 8192  }
 0x73d   :  { %3997 = vmatprep.subr.mxu0 %v4633_v0 }
 0x743   :  { %3984 = vmatmul.mubr.msk.f32.vlgmr.msra.gmra.mrb[12].mxu0 %vm1085_vm3, %v2021_v26 }
 0x744   :  { %3998 = vmatpush3.xpose.msk.msra.mxu0 %vm1085_vm3, %v5601_v24  ;;  %3999 = vmatprep.mubr.msk.f32.mxu0 %vm4635_vm0, %v4633_v0 }
 0x745   :  { %4002 = vmatprep.subr.mxu0 %v4633_v0 }
 0x747   :  { %4000 = vmatmul.mubr.msk.f32.vlgmr.msra.gmra.mrb[14].mxu0 %vm1085_vm3, %v2021_v26 }
 0x748   :  { %4004 = vmatprep.mubr.msk.f32.mxu0 %vm4635_vm0, %v4633_v0  ;;  %4003 = vmatpush3.msk.msra.mxu0 %vm2280_vm9, %v2275_v54  ;;  %v3048_v54 = vld [vmem:[%s5860_s22 + $0x58] sm:$0xff] }
 0x749   :  { %4416 = vmatprep.subr.bf16.mxu0 %v4634_v1 }
 0x816   :  { %v2102_v31 = vpop.f32.mrb[12].mxu0 }
 0x817   :  { %v3985_v7 = vpop.f32.mrb[13].mxu0  ;;  %v2107_v3 = vsel %vm2106_vm8, %v2102_v31, -inf }
 0x81a   :  { %v2259_v30 = vpop.f32.mrb[14].mxu0 }
 0x81b   :  { %v4001_v35 = vpop.f32.mrb[15].mxu0  ;;  %v2264_v46 = vsel %vm2263_vm7, %v2259_v30, -inf }
 0x81c   :  { %2265 = vmax.xlane.f32.xlu1 %v2264_v46  ;;  %v3041_v46 = vld [vmem:[%s5860_s22 + $0x20] sm:$0xff] }
 0x820   :  { %2108 = vmax.xlane.f32.xlu1 %v2107_v3  ;;  %v3042_v3 = vld [vmem:[%s5860_s22 + $0x28] sm:$0xff] }
 0x8a9   :  { %v2266_v52 = vpop.xlane.xlu1 %2265 }
 0x8aa   :  { %v2267_v60 = vsub.f32 %v2259_v30, %v2266_v52  ;;  %v4435_v52 = vpack.c.bf16 %v3042_v3, %v3041_v46 }
 0x8ac   :  { %v2268_v61 = vmul.f32 1.442695, %v2267_v60  ;;  %v3043_v60 = vld [vmem:[%s5860_s22 + $0x30] sm:$0xff] }
 0x8ad   :  { %v2109_v51 = vpop.xlane.xlu1 %2108 }
 0x8ae   :  { %4568 = vpow2.f32 %v2268_v61  ;;  %v2110_v36 = vsub.f32 %v2102_v31, %v2109_v51  ;;  %v3044_v61 = vld [vmem:[%s5860_s22 + $0x38] sm:$0xff] }
 0x8b0   :  { %v2111_v39 = vmul.f32 1.442695, %v2110_v36  ;;  %v4438_v36 = vpack.c.bf16 %v3044_v61, %v3043_v60 }
 0x8b2   :  { %4570 = vpow2.f32 %v2111_v39  ;;  %v3045_v39 = vld [vmem:[%s5860_s22 + $0x40] sm:$0xff] }
 0x8b8   :  { %v4569_v45 = vpop.eup %4568 }
 0x8b9   :  { %v2270_v47 = vsel %vm2263_vm7, %v4569_v45, 0.0 }
 0x8ba   :  { %2271 = vadd.xlane.f32.xlu0 %v2270_v47 }
 0x8bc   :  { %v4571_v49 = vpop.eup %4570 }
 0x8bd   :  { %v2113_v50 = vsel %vm2106_vm8, %v4571_v49, 0.0 }
 0x8be   :  { %2114 = vadd.xlane.f32.xlu0 %v2113_v50  ;;  %v3047_v50 = vld [vmem:[%s5860_s22 + $0x50] sm:$0xff] }
 0x947   :  { %v2272_v57 = vpop.xlane.xlu0 %2271 }
 0x948   :  { %4572 = vrcp.f32 %v2272_v57  ;;  %v4450_v57 = vpack.c.bf16 %v3048_v54, %v3047_v50  ;;  %v3359_v54 = vld [vmem:[%s5862_s24 + $0x20] sm:$0xff] }
 0x94b   :  { %v2115_v58 = vpop.xlane.xlu0 %2114 }
 0x94c   :  { %4574 = vrcp.f32 %v2115_v58 }
 0x952   :  { %v4573_v33 = vpop.eup %4572 }
 0x953   :  { %v2274_v59 = vmul.f32 %v4573_v33, %v4569_v45  ;;  %v3046_v45 = vld [vmem:[%s5860_s22 + $0x48] sm:$0xff] }
 0x954   :  { %v4447_v47 = vpack.c.bf16 %v3046_v45, %v3045_v39 }
 0x955   :  { %4005 = vmatmul.mubr.msk.f32.vlgmr.msra.gmra.mrb[16].mxu0 %vm2276_vm10, %v2274_v59 }
 0x956   :  { %v4575_v62 = vpop.eup %4574  ;;  %4418 = vmatpush3.bf16.msra.mxu0 %v4403_v21  ;;  %4015 = vmatprep.mubr.msk.f32.mxu0 %vm4635_vm0, %v4633_v0 }
 0x957   :  { %v2117_v56 = vmul.f32 %v4575_v62, %v4571_v49  ;;  %4419 = vmatprep.subr.bf16.mxu0 %v4634_v1 }
 0x959   :  { %3995 = vmatmul.mubr.msk.f32.vlgmr.msra.gmra.mrb[26].mxu1 %vm1085_vm3, %v2117_v56 }
 0x95a   :  { %4421 = vmatpush3.bf16.msra.mxu0 %v4407_v41  ;;  %4026 = vmatprep.mubr.msk.f32.mxu1 %vm4635_vm0, %v4633_v0  ;;  %v2532_v41 = vld [vmem:[%s5858_s20 + $0x8] sm:$0xff] }
 0x95b   :  { %4029 = vmatprep.subr.mxu0 %v4633_v0  ;;  %4424 = vmatpush3.bf16.msra.mxu1 %v4423_v9  ;;  %v4429_v43 = vpack.c.bf16 %v2532_v41, %v2531_v40  ;;  %v3358_v41 = vld [vmem:[%s5862_s24 + $0x18] sm:$0xff] }
 0x95c   :  { %4425 = vmatprep.subr.bf16.mxu1 %v4634_v1 }
 0x95f   :  { %4427 = vmatpush3.bf16.msra.mxu1 %v4426_v13 }
 0x960   :  { %4034 = vmatprep.subr.mxu1 %v4633_v0 }
 0xa28   :  { %v2350_v5 = vpop.f32.mrb[16].mxu0 }
 0xa29   :  { %v4006_v44 = vpop.f32.mrb[17].mxu0  ;;  %4016 = vmatmul.mubr.msk.f32.vlgmr.msra.gmra.mrb[18].mxu0 %vm1085_vm3, %v2350_v5 }
 0xa2a   :  { %4031 = vmatprep.mubr.msk.f32.mxu0 %vm4635_vm0, %v4633_v0 }
 0xa2c   :  { %v5639_v2 = vpop.f32.mrb[26].mxu1 }
 0xa2d   :  { %v3996_v48 = vpop.f32.mrb[27].mxu1  ;;  %v2437_v15 = vrot.slane %v5639_v2, %v5184_v28  ;;  %v3054_v49 = vmax.f32 %v5639_v2, 0.0 }
 0xa2f   :  { %v2438_v29 = vsel %vm2433_vm11, %v2437_v15, 0.0 }
 0xa30   :  { %v2439_v23 = vadd.f32 %v2438_v29, %v2432_v18  ;;  %v2533_v29 = vld [vmem:[%s5858_s20 + $0x10] sm:$0xff] }
 0xafc   :  { %v5654_v20 = vpop.f32.mrb[18].mxu0 }
 0xafd   :  { %v2444_v19 = vrot.slane %v5654_v20, %v5184_v28  ;;  %v4017_v22 = vpop.f32.mrb[19].mxu0  ;;  %v3202_v58 = vmax.f32 %v5654_v20, 0.0  ;;  %v2534_v20 = vld [vmem:[%s5858_s20 + $0x18] sm:$0xff] }
 0xaff   :  { %v2445_v27 = vsel %vm2440_vm13, %v2444_v19, 0.0  ;;  %v4432_v19 = vpack.c.bf16 %v2534_v20, %v2533_v29 }
 0xb00   :  { %v2446_v42 = vadd.f32 %v2445_v27, %v2439_v23  ;;  %v3037_v23 = vld [vmem:[%s5860_s22] sm:$0xff]  ;;  %v3038_v27 = vld [vmem:[%s5860_s22 + $0x8] sm:$0xff] }
 0xb02   :  { %4027 = vmatmul.mubr.msk.f32.vlgmr.msra.gmra.mrb[28].mxu1 %vm1085_vm3, %v2446_v42  ;;  %v4441_v42 = vpack.c.bf16 %v3038_v27, %v3037_v23 }
 0xb03   :  { %4036 = vmatprep.mubr.msk.f32.mxu1 %vm4635_vm0, %v4633_v0 }
 0xbd5   :  { %v2527_v11 = vpop.f32.mrb[28].mxu1 }
 0xbd6   :  { %v5662_v10 = vadd.f32 %v3512_v4, %v2527_v11  ;;  %v4028_v8 = vpop.f32.mrb[29].mxu1  ;;  %v3039_v4 = vld [vmem:[%s5860_s22 + $0x10] sm:$0xff]  ;;  %v3040_v11 = vld [vmem:[%s5860_s22 + $0x18] sm:$0xff] }
 0xbd8   :  { %2538 = vrot.lane.b32.xlu1 %v5662_v10, %s4636_s29  ;;  %v2536_v55 = vmul.f32 0.25, %v5662_v10  ;;  %s4640_s29 = smov 64  }
 0xbdc   :  { %2789 = vrot.lane.b32.xlu1 %v5662_v10, %s4638_s18 }
 0xbe0   :  { %2787 = vrot.lane.b32.xlu1 %v2536_v55, %s4639_s10 }
 0xc4a   :  { %v2539_v28 = vpop.permute.xlu1 %2538 }
 0xc4b   :  { %4030 = vmatpush3.xpose.msk.msra.mxu0 %vm2540_vm14, %v2539_v28  ;;  %v3053_v28 = vmax.f32 %v5601_v24, 0.0 }
 0xc4c   :  { %4428 = vmatprep.subr.bf16.mxu0 %v4634_v1 }
 0xc4e   :  { %4032 = vmatmul.mubr.msk.f32.vlgmr.msra.gmra.mrb[20].mxu0 %vm2540_vm14, %v2536_v55  ;;  %v2790_v30 = vpop.permute.xlu1 %2789  ;;  %v4444_v55 = vpack.c.bf16 %v3040_v11, %v3039_v4 }
 0xc4f   :  { %4043 = vmatprep.mubr.msk.f32.mxu0 %vm4635_vm0, %v4633_v0  ;;  %4430 = vmatpush3.bf16.msra.mxu0 %v4429_v43 }
 0xc50   :  { %4051 = vmatprep.subr.mxu0 %v4633_v0 }
 0xc52   :  { %v2788_v51 = vpop.permute.xlu1 %2787 }
 0xd21   :  { %v2612_v14 = vpop.f32.mrb[20].mxu0 }
 0xd22   :  { %v4033_v12 = vpop.f32.mrb[21].mxu0  ;;  %v2617_v16 = vsel %vm2616_vm15, %v2612_v14, -inf }
 0xd23   :  { %2618 = vmax.xlane.f32.xlu0 %v2617_v16  ;;  %v3049_v12 = vld [vmem:[%s5860_s22 + $0x60] sm:$0xff]  ;;  %v3050_v16 = vld [vmem:[%s5860_s22 + $0x68] sm:$0xff] }
 0xd24   :  { %v4453_v24 = vpack.c.bf16 %v3050_v16, %v3049_v12 }
 0xdb0   :  { %v2619_v17 = vpop.xlane.xlu0 %2618 }
 0xdb1   :  { %v2620_v37 = vsub.f32 %v2612_v14, %v2619_v17  ;;  %v3129_v14 = vrot.slane %v3053_v28, 2  ;;  %v3051_v17 = vld [vmem:[%s5860_s22 + $0x70] sm:$0xff] }
 0xdb3   :  { %v2621_v21 = vmul.f32 1.442695, %v2620_v37 }
 0xdb5   :  { %4576 = vpow2.f32 %v2621_v21  ;;  %v3355_v21 = vld [vmem:[%s5862_s24] sm:$0xff] }
 0xdbf   :  { %v4577_v25 = vpop.eup %4576 }
 0xdc0   :  { %v2623_v38 = vsel %vm2616_vm15, %v4577_v25, 0.0 }
 0xdc1   :  { %2624 = vadd.xlane.f32.xlu0 %v2623_v38  ;;  %v3357_v38 = vld [vmem:[%s5862_s24 + $0x10] sm:$0xff] }
 0xdc2   :  { %v4462_v43 = vpack.c.bf16 %v3358_v41, %v3357_v38 }
 0xdd7   :  { %2628 = vrot.lane.b32.xlu0 %v5662_v10, %s4640_s29 }
 0xe4e   :  { %v2625_v26 = vpop.xlane.xlu0 %2624 }
 0xe4f   :  { %4578 = vrcp.f32 %v2625_v26  ;;  %v3519_v26 = vld [vmem:[%s5859_s21] ss:$0 sm:$0xff] }
 0xe52   :  { %v2629_v31 = vpop.permute.xlu0 %2628 }
 0xe53   :  { %4035 = vmatpush3.msk.msra.mxu1 %vm2634_vm2, %v2629_v31 }
 0xe54   :  { %4046 = vmatprep.subr.mxu1 %v4633_v0 }
 0xe59   :  { %v4579_v7 = vpop.eup %4578 }
 0xe5a   :  { %v2627_v35 = vmul.f32 %v4579_v7, %v4577_v25  ;;  %v3356_v25 = vld [vmem:[%s5862_s24 + $0x8] sm:$0xff] }
 0xe5b   :  { %v4459_v40 = vpack.c.bf16 %v3356_v25, %v3355_v21 }
 0xe5c   :  { %4037 = vmatmul.mubr.msk.f32.vlgmr.msra.gmra.mrb[30].mxu1 %vm2630_vm4, %v2627_v35 }
 0xe5d   :  { %4047 = vmatpush3.xpose.msk.msra.mxu1 %vm2540_vm14, %v2790_v30  ;;  %4048 = vmatprep.mubr.msk.f32.mxu1 %vm4635_vm0, %v4633_v0 }
 0xe5e   :  { %4434 = vmatprep.subr.bf16.mxu1 %v4634_v1 }
 0xe60   :  { %4049 = vmatmul.mubr.msk.f32.vlgmr.msra.gmra.mrb[32].mxu1 %vm2540_vm14, %v2788_v51 }
 0xe61   :  { %4436 = vmatpush3.bf16.msra.mxu1 %v4435_v52  ;;  %4071 = vmatprep.mubr.msk.f32.mxu1 %vm4635_vm0, %v4633_v0 }
 0xe62   :  { %4437 = vmatprep.subr.bf16.mxu1 %v4634_v1 }
 0xe65   :  { %4439 = vmatpush3.bf16.msra.mxu1 %v4438_v36 }
 0xe66   :  { %4446 = vmatprep.subr.bf16.mxu1 %v4634_v1 }
 0xe68   :  { %4072 = vmatmul.mubr.msk.f32.vlgmr.msra.gmra.mrb[34].mxu1 %vm1085_vm3, %v3054_v49 }
 0xe69   :  { %4448 = vmatpush3.bf16.msra.mxu1 %v4447_v47  ;;  %4093 = vmatprep.mubr.msk.f32.mxu1 %vm4635_vm0, %v4633_v0 }
 0xe6a   :  { %4449 = vmatprep.subr.bf16.mxu1 %v4634_v1 }
 0xe6d   :  { %4451 = vmatpush3.bf16.msra.mxu1 %v4450_v57  ;;  %v3360_v57 = vld [vmem:[%s5862_s24 + $0x28] sm:$0xff] }
 0xe6e   :  { %4458 = vmatprep.subr.bf16.mxu1 %v4634_v1 }
 0xe70   :  { %4094 = vmatmul.mubr.msk.f32.vlgmr.msra.gmra.mrb[36].mxu1 %vm1085_vm3, %v3202_v58  ;;  %v4465_v58 = vpack.c.bf16 %v3360_v57, %v3359_v54 }
 0xe71   :  { %4123 = vmatprep.mubr.msk.f32.mxu1 %vm4635_vm0, %v4633_v0  ;;  %4460 = vmatpush3.bf16.msra.mxu1 %v4459_v40 }
 0xe72   :  { %4461 = vmatprep.subr.bf16.mxu1 %v4634_v1 }
 0xe75   :  { %4463 = vmatpush3.bf16.msra.mxu1 %v4462_v43 }
 0xe76   :  { %4464 = vmatprep.subr.bf16.mxu1 %v4634_v1 }
 0xe79   :  { %4466 = vmatpush3.bf16.msra.mxu1 %v4465_v58 }
 0xe7a   :  { %4467 = vmatprep.subr.bf16.mxu1 %v4634_v1 }
 0xf2f   :  { %v2703_v33 = vpop.f32.mrb[30].mxu1 }
 0xf30   :  { %v4038_v59 = vpop.f32.mrb[31].mxu1  ;;  %4044 = vmatmul.mubr.msk.f32.vlgmr.msra.gmra.mrb[22].mxu0 %vm2540_vm14, %v2703_v33  ;;  %v3361_v33 = vld [vmem:[%s5862_s24 + $0x30] sm:$0xff] }
 0xf31   :  { %4053 = vmatprep.mubr.msk.f32.mxu0 %vm4635_vm0, %v4633_v0  ;;  %v3362_v59 = vld [vmem:[%s5862_s24 + $0x38] sm:$0xff]  ;;  %s4606_s24 = scalar_lea.vmem %s3445_s15, 16 }
 0xf32   :  { %p4607_p8 = scmp.ne.s32.totalorder %s3445_s15, %s4606_s24 }
 0xf33   :  { %v2861_v62 = vpop.f32.mrb[32].mxu1 }
 0xf34   :  { %v4050_v56 = vpop.f32.mrb[33].mxu1  ;;  %v2865_v34 = vsel %vm2616_vm15, %v2861_v62, -inf }
 0xf35   :  { %2866 = vmax.xlane.f32.xlu1 %v2865_v34  ;;  %v3352_v34 = vld [vmem:[%s5861_s23] sm:$0x1]  ;;  %s4610_s23 = scalar_lea.vmem %s3445_s15, 32 }
 0xf36   :  { %p4612_p10 = scmp.lt.s32.totalorder %s4610_s23, %s4606_s24 }
 0xf38   :  { %p4613_p11 = por %p4612_p10, %p4611_p9 }
 0xf3a   :  { %p4614_p12 = pnand %p4613_p11, %p4607_p8 }
 0xf3b   :  { %v5733_v63 = vpop.f32.mrb[34].mxu1 }
 0xf3c   :  { %v4073_v9 = vpop.f32.mrb[35].mxu1 }
 0xf43   :  { %v5735_v5 = vpop.f32.mrb[36].mxu1 }
 0xf44   :  { %v4095_v44 = vpop.f32.mrb[37].mxu1 }
 0xf46   :  { %2876 = vrot.lane.b32.xlu1 %v5662_v10, %s4641_s0 }
 0xfc2   :  { %v2867_v2 = vpop.xlane.xlu1 %2866 }
 0xfc3   :  { %v2868_v48 = vsub.f32 %v2861_v62, %v2867_v2  ;;  %v4468_v62 = vpack.c.bf16 %v3362_v59, %v3361_v33 }
 0xfc5   :  { %v2869_v6 = vmul.f32 1.442695, %v2868_v48  ;;  %4469 = vmatpush3.bf16.msra.mxu1 %v4468_v62 }
 0xfc6   :  { %v2877_v32 = vpop.permute.xlu1 %2876 }
 0xfc7   :  { %4580 = vpow2.f32 %v2869_v6  ;;  %4052 = vmatpush3.msk.msra.mxu0 %vm2634_vm2, %v2877_v32 }
 0xfc8   :  { %4431 = vmatprep.subr.bf16.mxu0 %v4634_v1 }
 0xfd1   :  { %v4581_v13 = vpop.eup %4580 }
 0xfd2   :  { %v2871_v15 = vsel %vm2616_vm15, %v4581_v13, 0.0 }
 0xfd3   :  { %2872 = vadd.xlane.f32.xlu0 %v2871_v15 }
0x1060   :  { %v2873_v53 = vpop.xlane.xlu0 %2872 }
0x1061   :  { %4582 = vrcp.f32 %v2873_v53 }
0x106b   :  { %v4583_v18 = vpop.eup %4582 }
0x106c   :  { %v2875_v22 = vmul.f32 %v4583_v18, %v4581_v13 }
0x106e   :  { %4054 = vmatmul.mubr.msk.f32.vlgmr.msra.gmra.mrb[24].mxu0 %vm2630_vm4, %v2875_v22 }
0x106f   :  { %4433 = vmatpush3.bf16.msra.mxu0 %v4432_v19  ;;  %4060 = vmatprep.mubr.msk.f32.mxu0 %vm4635_vm0, %v4633_v0 }
0x1070   :  { %4440 = vmatprep.subr.bf16.mxu0 %v4634_v1 }
0x1141   :  { %v2949_v10 = vpop.f32.mrb[24].mxu0 }
0x1142   :  { %v4055_v8 = vpop.f32.mrb[25].mxu0  ;;  %4061 = vmatmul.mubr.msk.f32.vlgmr.msra.gmra.mrb[22].mxu0 %vm2540_vm14, %v2949_v10 }
0x1143   :  { %4442 = vmatpush3.bf16.msra.mxu0 %v4441_v42  ;;  %4082 = vmatprep.mubr.msk.f32.mxu0 %vm4635_vm0, %v4633_v0 }
0x1144   :  { %4443 = vmatprep.subr.bf16.mxu0 %v4634_v1 }
0x1147   :  { %4445 = vmatpush3.bf16.msra.mxu0 %v4444_v55 }
0x1148   :  { %4452 = vmatprep.subr.bf16.mxu0 %v4634_v1 }
0x114a   :  { %4083 = vmatmul.mubr.msk.f32.vlgmr.msra.gmra.mrb[26].mxu0 %vm1085_vm3, %v3129_v14 }
0x114b   :  { %4104 = vmatprep.mubr.msk.f32.mxu0 %vm4635_vm0, %v4633_v0  ;;  %4454 = vmatpush3.bf16.msra.mxu0 %v4453_v24  ;;  %v3052_v0 = vld [vmem:[%s5860_s22 + $0x78] sm:$0xff]  ;;  %vm3027_vm0 = vcmask 256000  }
0x114c   :  { %4455 = vmatprep.subr.bf16.mxu0 %v4634_v1  ;;  %v4456_v37 = vpack.c.bf16 %v3052_v0, %v3051_v17  ;;  %v3363_v1 = vld [vmem:[%s5863_s25] sm:$0x1] }
0x114f   :  { %4457 = vmatpush3.bf16.msra.mxu0 %v4456_v37 }
0x1215   :  { %v3022_v31 = vpop.f32.mrb[22].mxu0 }
0x1216   :  { %v4470_v7 = vadd.f32 %v3519_v26, %v3022_v31  ;;  %v4062_v30 = vpop.f32.mrb[23].mxu0 }
0x1218   :  { %v3028_v35 = vsel %vm3027_vm0, %v4470_v7, 0.0 }
0x1219   :  { %v3029_v46 = vrot.slane %v3028_v35, 4 }
0x121b   :  { %v3030_v3 = vadd.f32 %v3029_v46, %v3028_v35 }
0x121d   :  { %v3031_v52 = vrot.slane %v3030_v3, 2  ;;  %v3198_v60 = vpop.f32.mrb[26].mxu0 }
0x121e   :  { %v3199_v61 = vadd.f32 %v3198_v60, %v5733_v63  ;;  %v4084_v51 = vpop.f32.mrb[27].mxu0 }
0x121f   :  { %v3032_v36 = vadd.f32 %v3031_v52, %v3030_v3 }
0x1220   :  { %v3276_v39 = vadd.f32 %v5735_v5, %v3199_v61 }
0x1221   :  { %v3033_v45 = vrot.slane %v3032_v36, 1 }
0x1223   :  { %v3034_v47 = vadd.f32 %v3033_v45, %v3032_v36 }
0x1225   :  { %v3036_v49 = vmul.f32 0.33333334, %v3034_v47 }
0x1227   :  { %v3277_v50 = vmax.f32 %v3036_v49, 0.0 }
0x1229   :  { %4105 = vmatmul.mubr.msk.f32.vlgmr.msra.gmra.mrb[28].mxu0 %vm1085_vm3, %v3277_v50 }
0x12fc   :  { %v3347_v56 = vpop.f32.mrb[28].mxu0 }
0x12fd   :  { %v3351_v63 = vadd.f32 %v3347_v56, %v3276_v39  ;;  %v4106_v9 = vpop.f32.mrb[29].mxu0 }
0x12ff   :  { %v3353_v5 = vadd.f32 %v3352_v34, %v3351_v63 }
0x1301   :  { %v3354_v44 = vmax.f32 %v3353_v5, 0.0 }
0x1303   :  { %4124 = vmatmul.mubr.msk.f32.vlgmr.msra.gmra.mrb[38].mxu1 %vm142_vm1, %v3354_v44 }
0x13d6   :  { %v3433_v2 = vpop.f32.mrb[38].mxu1 }
0x13d7   :  { %v3434_v48 = vadd.f32 %v3433_v2, %v3363_v1  ;;  %v4125_v6 = vpop.f32.mrb[39].mxu1 }
0x13d9   :  { %3437 = vst.msk [vmem:[#allocation7] sm:$0x1] %vm2106_vm8, %v3434_v48 }
0x13da   :  { %4617 = shalt.err (!%p4614_p12)
}
0x13db   :  { %s4618_s25 = scalar_lea.hbm %s5865_s27, 16 }
0x13dc   :  { %p4619_p13 = scmp.ne.s32.totalorder %s5865_s27, %s4618_s25  ;;  %p4622_p0 = scmp.lt.u32.totalorder %s4618_s25, %s5865_s27 }
0x13de   :  { %p4624_p1 = pnand %p4622_p0, %p4619_p13 }
0x13e0   :  { %4627 = shalt.err (!%p4624_p1)
}
0x13e1   :  { %3447 = dma.vmem_to_hbm [thread:$0]  %s3445_s15, 16, %s5865_s27, [#allocation6]  }
0x13e2   :  { %4630 = dma.done.wait [#allocation6], 16  }
0x13e3   :  { %4631 = vsyncadd [#allocation6], 4294967280 }
0x13e4   :  { %3451 = vsyncpa [#allocation5], 1 }
0x13e5   :  { %3452 = vsyncpa [#allocation6], 1 }

</bundles_post_ra>
